<compile_context>
chip_gen: v6e
topology: v6e:2x2x1
jax: 0.10.0
libtpu: 0.0.40
codegen_flags: <defaults>
</compile_context>

<pallas_src>
import functools

import jax
import jax.numpy as jnp
from jax import lax
from jax.experimental import pallas as pl
from jax.experimental.pallas import tpu as pltpu

BN_EPS = 1e-5
LANES = 128            # lane-pad target for all node/edge activations in HBM


def _round_up(n, m):
    return ((n + m - 1) // m) * m


def _tile_and_pad(n, cap):
    """Pick a row tile (multiple of 8, <= cap, cap multiple of 128) and pad n."""
    t = min(cap, _round_up(n, 8))
    return t, _round_up(n, t)


# -----------------------------------------------------------------------------
# Kernels
# -----------------------------------------------------------------------------
def _linear_kernel(x_ref, w_ref, b_ref, o_ref, *, relu):
    y = jnp.dot(x_ref[...], w_ref[...], preferred_element_type=jnp.float32)
    y = y + b_ref[...]
    if relu:
        y = jnp.maximum(y, 0.0)
    o_ref[...] = y


def pallas_linear(x, w, b, *, relu=False, row_tile):
    """Row-tiled out = x @ w + b (optionally relu). Weights stay resident."""
    m, k = x.shape
    n = w.shape[1]
    assert m % row_tile == 0
    return pl.pallas_call(
        functools.partial(_linear_kernel, relu=relu),
        out_shape=jax.ShapeDtypeStruct((m, n), jnp.float32),
        grid=(m // row_tile,),
        in_specs=[
            pl.BlockSpec((row_tile, k), lambda i: (i, 0)),
            pl.BlockSpec((k, n), lambda i: (0, 0)),
            pl.BlockSpec((1, n), lambda i: (0, 0)),
        ],
        out_specs=pl.BlockSpec((row_tile, n), lambda i: (i, 0)),
        compiler_params=pltpu.CompilerParams(dimension_semantics=("parallel",)),
    )(x, w, b.reshape(1, n))


def _grgc_kernel(nout_ref, rel_ref, ew_ref, msg_ref, w_ref, b_ref, o_ref, acc_ref,
                 *, num_relation, tile_n, lanes):
    """Fused relational scatter-add + linear + relu (GeometricRelationalGraphConv)."""
    j = pl.program_id(1)

    @pl.when(j == 0)
    def _():
        acc_ref[...] = jnp.zeros_like(acc_ref)

    nout = nout_ref[...]                                    # [1, TE] int32
    rel = rel_ref[...]                                      # [1, TE] int32
    ew = ew_ref[...]                                        # [1, TE] f32 (0 on padded edges)
    msg = msg_ref[...]                                      # [TE, 128]
    tile_e = msg.shape[0]
    rows = (lax.broadcasted_iota(jnp.int32, (tile_n, tile_e), 0)
            + pl.program_id(0) * tile_n)                    # dest node ids
    node_match = rows == nout                               # [TN, TE]
    for r in range(num_relation):                           # small static unroll
        sel = jnp.where(node_match & (rel == r), ew, 0.0)   # weights folded into one-hot
        acc_ref[:, r * lanes:(r + 1) * lanes] += jnp.dot(
            sel, msg, preferred_element_type=jnp.float32)

    @pl.when(j == pl.num_programs(1) - 1)
    def _():
        y = jnp.dot(acc_ref[...], w_ref[...],
                    preferred_element_type=jnp.float32) + b_ref[...]
        o_ref[...] = jnp.maximum(y, 0.0)


def pallas_grgc(node_out, rel, ew, msg, w, b, *, num_relation, n_dest, tile_n, tile_e):
    e_pad, lanes = msg.shape
    n_cols = w.shape[1]
    grid = (n_dest // tile_n, e_pad // tile_e)
    return pl.pallas_call(
        functools.partial(_grgc_kernel, num_relation=num_relation,
                          tile_n=tile_n, lanes=lanes),
        out_shape=jax.ShapeDtypeStruct((n_dest, n_cols), jnp.float32),
        grid=grid,
        in_specs=[
            pl.BlockSpec((1, tile_e), lambda i, j: (0, j)),            # node_out
            pl.BlockSpec((1, tile_e), lambda i, j: (0, j)),            # relation
            pl.BlockSpec((1, tile_e), lambda i, j: (0, j)),            # edge weight
            pl.BlockSpec((tile_e, lanes), lambda i, j: (j, 0)),        # gathered messages
            pl.BlockSpec((num_relation * lanes, n_cols), lambda i, j: (0, 0)),  # W (resident)
            pl.BlockSpec((1, n_cols), lambda i, j: (0, 0)),            # b (resident)
        ],
        out_specs=pl.BlockSpec((tile_n, n_cols), lambda i, j: (i, 0)),
        scratch_shapes=[pltpu.VMEM((tile_n, num_relation * lanes), jnp.float32)],
        compiler_params=pltpu.CompilerParams(
            dimension_semantics=("parallel", "arbitrary")),
    )(node_out, rel, ew, msg, w, b.reshape(1, n_cols))


def _ieconv_edge_kernel(xg_ref, ef_ref, w1_ref, b1_ref, kw1_ref, kb1_ref,
                        kw2b_ref, kb2b_ref, kw2m_ref, kb2m_ref, t_ref, s_ref,
                        o_ref):
    """Fused per-edge IEConv message: relu -> linear1 -> kernel MLP -> einsum."""
    xr = jnp.maximum(xg_ref[...], 0.0)                       # relu(input_bn(x)) (bn folded)
    msg = jnp.dot(xr, w1_ref[...], preferred_element_type=jnp.float32) + b1_ref[...]
    msg = jnp.maximum(msg, 0.0)                              # message_bn folded + relu
    kh = jnp.dot(ef_ref[...], kw1_ref[...],
                 preferred_element_type=jnp.float32) + kb1_ref[...]
    kh = jnp.maximum(kh, 0.0)                                # kernel MLP hidden
    kbias = jnp.dot(kh, kw2b_ref[...],
                    preferred_element_type=jnp.float32) + kb2b_ref[...]   # kernel[:,0,:]
    kmat = jnp.dot(kh, kw2m_ref[...],
                   preferred_element_type=jnp.float32) + kb2m_ref[...]    # kernel[:,1:,:] flat
    # einsum('ijk,ik->ij', kernel[:,1:,:], msg) via constant selection matmuls
    msg_tile = jnp.dot(msg, t_ref[...], preferred_element_type=jnp.float32)
    o_ref[...] = (jnp.dot(kmat * msg_tile, s_ref[...],
                          preferred_element_type=jnp.float32) + kbias)


def pallas_ieconv_edge(xg, ef, lp, *, hidden_dim, tile_e):
    e_pad, lanes = xg.shape
    ef_dim = ef.shape[1]
    kh_dim = lp["kw1"].shape[1]
    h = hidden_dim
    resident = lambda i: (0, 0)
    return pl.pallas_call(
        _ieconv_edge_kernel,
        out_shape=jax.ShapeDtypeStruct((e_pad, h), jnp.float32),
        grid=(e_pad // tile_e,),
        in_specs=[
            pl.BlockSpec((tile_e, lanes), lambda i: (i, 0)),     # gathered node features
            pl.BlockSpec((tile_e, ef_dim), lambda i: (i, 0)),    # edge geometric features
            pl.BlockSpec((lanes, h), resident),                  # w1
            pl.BlockSpec((1, h), resident),                      # b1
            pl.BlockSpec((ef_dim, kh_dim), resident),            # kernel MLP layer 1
            pl.BlockSpec((1, kh_dim), resident),
            pl.BlockSpec((kh_dim, h), resident),                 # kernel MLP layer 2 (bias part)
            pl.BlockSpec((1, h), resident),
            pl.BlockSpec((kh_dim, h * h), resident),             # kernel MLP layer 2 (matrix part)
            pl.BlockSpec((1, h * h), resident),
            pl.BlockSpec((h, h * h), resident),                  # constant T
            pl.BlockSpec((h * h, h), resident),                  # constant S
        ],
        out_specs=pl.BlockSpec((tile_e, h), lambda i: (i, 0)),
        compiler_params=pltpu.CompilerParams(dimension_semantics=("parallel",)),
    )(xg, ef, lp["w1"], lp["b1"].reshape(1, h),
      lp["kw1"], lp["kb1"].reshape(1, kh_dim),
      lp["kw2b"], lp["kb2b"].reshape(1, h),
      lp["kw2m"], lp["kb2m"].reshape(1, h * h),
      lp["T"], lp["S"])


def _ieconv_combine_kernel(nout_ref, ew_ref, msg_ref, w2_ref, b2_ref,
                           grgc_ref, short_ref, o_ref, acc_ref,
                           *, tile_n, add_shortcut):
    """Fused IEConv aggregate (scatter-add) + relu + linear2 + GRGC add + shortcut."""
    j = pl.program_id(1)

    @pl.when(j == 0)
    def _():
        acc_ref[...] = jnp.zeros_like(acc_ref)

    nout = nout_ref[...]
    ew = ew_ref[...]
    msg = msg_ref[...]
    tile_e = msg.shape[0]
    rows = (lax.broadcasted_iota(jnp.int32, (tile_n, tile_e), 0)
            + pl.program_id(0) * tile_n)
    sel = jnp.where(rows == nout, ew, 0.0)
    acc_ref[...] += jnp.dot(sel, msg, preferred_element_type=jnp.float32)

    @pl.when(j == pl.num_programs(1) - 1)
    def _():
        upd = jnp.maximum(acc_ref[...], 0.0)                 # update_bn folded + relu
        y = jnp.dot(upd, w2_ref[...], preferred_element_type=jnp.float32) + b2_ref[...]
        y = y + grgc_ref[...]                                # hidden = grgc + ieconv
        if add_shortcut:
            y = y + short_ref[...]                           # residual (short_cut=True)
        o_ref[...] = y


def pallas_ieconv_combine(node_out, ew, msg, w2, b2, grgc_out, short, *,
                          n_dest, tile_n, tile_e, add_shortcut):
    e_pad, h = msg.shape
    lanes = w2.shape[1]
    grid = (n_dest // tile_n, e_pad // tile_e)
    return pl.pallas_call(
        functools.partial(_ieconv_combine_kernel, tile_n=tile_n,
                          add_shortcut=add_shortcut),
        out_shape=jax.ShapeDtypeStruct((n_dest, lanes), jnp.float32),
        grid=grid,
        in_specs=[
            pl.BlockSpec((1, tile_e), lambda i, j: (0, j)),          # node_out
            pl.BlockSpec((1, tile_e), lambda i, j: (0, j)),          # edge weight
            pl.BlockSpec((tile_e, h), lambda i, j: (j, 0)),          # edge messages
            pl.BlockSpec((h, lanes), lambda i, j: (0, 0)),           # w2 (resident)
            pl.BlockSpec((1, lanes), lambda i, j: (0, 0)),           # b2 (resident)
            pl.BlockSpec((tile_n, lanes), lambda i, j: (i, 0)),      # grgc output block
            pl.BlockSpec((tile_n, lanes), lambda i, j: (i, 0)),      # shortcut block
        ],
        out_specs=pl.BlockSpec((tile_n, lanes), lambda i, j: (i, 0)),
        scratch_shapes=[pltpu.VMEM((tile_n, h), jnp.float32)],
        compiler_params=pltpu.CompilerParams(
            dimension_semantics=("parallel", "arbitrary")),
    )(node_out, ew, msg, w2, b2.reshape(1, lanes), grgc_out, short)


def _segment_sum_kernel(seg_ref, wt_ref, feat_ref, o_ref, acc_ref, *, tile_g):
    """Tiled weighted segment sum (SumReadout); weights mask padded nodes."""
    j = pl.program_id(1)

    @pl.when(j == 0)
    def _():
        acc_ref[...] = jnp.zeros_like(acc_ref)

    seg = seg_ref[...]
    wt = wt_ref[...]
    feat = feat_ref[...]
    tile_rows = feat.shape[0]
    rows = (lax.broadcasted_iota(jnp.int32, (tile_g, tile_rows), 0)
            + pl.program_id(0) * tile_g)
    sel = jnp.where(rows == seg, wt, 0.0)
    acc_ref[...] += jnp.dot(sel, feat, preferred_element_type=jnp.float32)

    @pl.when(j == pl.num_programs(1) - 1)
    def _():
        o_ref[...] = acc_ref[...]


def pallas_segment_sum(seg, wt, feat, *, n_dest, tile_g, tile_rows):
    rows_pad, lanes = feat.shape
    grid = (n_dest // tile_g, rows_pad // tile_rows)
    return pl.pallas_call(
        functools.partial(_segment_sum_kernel, tile_g=tile_g),
        out_shape=jax.ShapeDtypeStruct((n_dest, lanes), jnp.float32),
        grid=grid,
        in_specs=[
            pl.BlockSpec((1, tile_rows), lambda i, j: (0, j)),
            pl.BlockSpec((1, tile_rows), lambda i, j: (0, j)),
            pl.BlockSpec((tile_rows, lanes), lambda i, j: (j, 0)),
        ],
        out_specs=pl.BlockSpec((tile_g, lanes), lambda i, j: (i, 0)),
        scratch_shapes=[pltpu.VMEM((tile_g, lanes), jnp.float32)],
        compiler_params=pltpu.CompilerParams(
            dimension_semantics=("parallel", "arbitrary")),
    )(seg, wt, feat)


# -----------------------------------------------------------------------------
# Plain-JAX glue: geometric edge features (tiny [N,3] math + gathers)
# -----------------------------------------------------------------------------
def _normalize(v, eps=1e-12):
    n = jnp.sqrt(jnp.sum(v * v, axis=-1, keepdims=True))
    return v / jnp.maximum(n, eps)


def get_ieconv_edge_feature(pos, bead2residue, node_in, node_out):
    u = jnp.ones_like(pos)
    u = u.at[1:].set(pos[1:] - pos[:-1])
    u = _normalize(u)
    b = jnp.ones_like(pos)
    b = b.at[:-1].set(u[:-1] - u[1:])
    b = _normalize(b)
    n = jnp.ones_like(pos)
    n = n.at[:-1].set(jnp.cross(u[:-1], u[1:]))
    n = _normalize(n)
    local_frame = jnp.stack([b, n, jnp.cross(b, n)], axis=-1)          # [N, 3, 3]

    t = pos[node_out] - pos[node_in]
    t = jnp.einsum("ijk,ij->ik", local_frame[node_in], t)              # [E, 3]
    r = jnp.sum(local_frame[node_in] * local_frame[node_out], axis=1)  # [E, 3]
    delta = jnp.abs(bead2residue[node_in] - bead2residue[node_out]).astype(jnp.float32) / 6.0
    delta = delta[:, None]
    return jnp.concatenate(
        [t, r, delta, 1 - 2 * jnp.abs(t), 1 - 2 * jnp.abs(r), 1 - 2 * jnp.abs(delta)],
        axis=-1,
    )                                                                  # [E, 14]


# -----------------------------------------------------------------------------
# Forward
# -----------------------------------------------------------------------------
def make_forward(*, input_dim, embedding_dim, hidden_dims, num_relation,
                 num_node, num_edge, num_graphs, short_cut=True):
    dims = [embedding_dim] + list(hidden_dims)
    out_dim = hidden_dims[-1]
    tn, n_pad = _tile_and_pad(num_node, 256)     # node row tile / padded rows
    te, e_pad = _tile_and_pad(num_edge, 512)     # edge row tile / padded rows
    tg, g_pad = _tile_and_pad(num_graphs, 128)   # graph row tile / padded rows

    @jax.jit
    def forward(params, graph, x):
        # ---- pad rows (features are lane-padded to 128 via the weight layout) ----
        xp = jnp.pad(x.astype(jnp.float32), ((0, n_pad - num_node), (0, 0)))

        edge_list = graph["edge_list"]
        node_in = edge_list[:, 0].astype(jnp.int32)
        node_out = edge_list[:, 1].astype(jnp.int32)
        rel = edge_list[:, 2].astype(jnp.int32)
        ew = graph["edge_weight"].astype(jnp.float32)
        ef = get_ieconv_edge_feature(graph["node_position"], graph["bead2residue"],
                                     node_in, node_out)                      # [E, 14]

        epad = e_pad - num_edge
        node_in_p = jnp.pad(node_in, (0, epad))                  # padded edges read node 0
        node_out_p = jnp.pad(node_out, (0, epad)).reshape(1, e_pad)
        rel_p = jnp.pad(rel, (0, epad)).reshape(1, e_pad)
        ew_p = jnp.pad(ew, (0, epad)).reshape(1, e_pad)          # weight 0 => no contribution
        ef_p = jnp.pad(ef, ((0, epad), (0, 0)))

        n2g = jnp.pad(graph["node2graph"].astype(jnp.int32), (0, n_pad - num_node))
        n2g = n2g.reshape(1, n_pad)
        node_mask = (jnp.arange(n_pad) < num_node).astype(jnp.float32).reshape(1, n_pad)

        # ---- embedding linear (embedding_batch_norm folded into weights) ----
        layer_input = pallas_linear(xp, params["emb_w"], params["emb_b"],
                                    relu=False, row_tile=tn)                 # [n_pad, 128]

        for i, lp in enumerate(params["layers"]):
            h = dims[i] // 4
            add_shortcut = short_cut and dims[i + 1] == dims[i]
            # TODO(synk): fold this XLA row gather into the edge-tiled kernels via
            # scalar-prefetch to save one HBM round trip of [E, 128] per layer.
            xg = layer_input[node_in_p]                                       # [e_pad, 128]

            grgc_out = pallas_grgc(node_out_p, rel_p, ew_p, xg,
                                   lp["wg"], lp["bg"],
                                   num_relation=num_relation, n_dest=n_pad,
                                   tile_n=tn, tile_e=te)                      # [n_pad, 128]

            msg = pallas_ieconv_edge(xg, ef_p, lp, hidden_dim=h, tile_e=te)   # [e_pad, h]

            layer_input = pallas_ieconv_combine(
                node_out_p, ew_p, msg, lp["w2"], lp["b2"], grgc_out, layer_input,
                n_dest=n_pad, tile_n=tn, tile_e=te, add_shortcut=add_shortcut)

        node_feature = layer_input                               # concat_hidden=False
        graph_feature = pallas_segment_sum(n2g, node_mask, node_feature,
                                           n_dest=g_pad, tile_g=tg, tile_rows=tn)
        return {
            "node_feature": node_feature[:num_node, :out_dim],
            "graph_feature": graph_feature[:num_graphs, :out_dim],
        }

    return forward


# -----------------------------------------------------------------------------
# Deterministic parameter / input construction
# -----------------------------------------------------------------------------
def init_linear(key, in_dim, out_dim, scale=0.1):
    k1, k2 = jax.random.split(key)
    return {
        "w": jax.random.normal(k1, (in_dim, out_dim), jnp.float32) * scale,
        "b": jax.random.normal(k2, (out_dim,), jnp.float32) * scale,
    }


def build_params(key, input_dim, embedding_dim, hidden_dims, num_relation):
    dims = [embedding_dim] + list(hidden_dims)
    keys = jax.random.split(key, 1 + 6 * (len(dims) - 1))
    emb = init_linear(keys[0], input_dim, embedding_dim)
    layers_p, ieconvs_p = [], []
    ki = 1
    for i in range(len(dims) - 1):
        lin = init_linear(keys[ki], num_relation * dims[i], dims[i + 1]); ki += 1
        layers_p.append(lin)
        h = dims[i] // 4
        l1 = init_linear(keys[ki], dims[i], h); ki += 1
        l2 = init_linear(keys[ki], h, dims[i + 1]); ki += 1
        k1 = init_linear(keys[ki], 14, 32); ki += 1
        k2 = init_linear(keys[ki], 32, (h + 1) * h); ki += 1
        ieconvs_p.append({
            "w1": l1["w"], "b1": l1["b"],
            "w2": l2["w"], "b2": l2["b"],
            "kw1": k1["w"], "kb1": k1["b"],
            "kw2": k2["w"], "kb2": k2["b"],
        })
    return {"emb_w": emb["w"], "emb_b": emb["b"],
            "layers": layers_p, "ieconvs": ieconvs_p}


def prepare_params(raw, *, input_dim, embedding_dim, hidden_dims, num_relation):
    """Fold BatchNorm-eval scaling into weights and pad feature dims to 128 lanes."""
    s = float(1.0 / jnp.sqrt(1.0 + BN_EPS))
    P = LANES
    dims = [embedding_dim] + list(hidden_dims)

    emb_w = jnp.zeros((input_dim, P), jnp.float32).at[:, :embedding_dim].set(raw["emb_w"] * s)
    emb_b = jnp.zeros((P,), jnp.float32).at[:embedding_dim].set(raw["emb_b"] * s)

    layers = []
    for i, (lp, ip) in enumerate(zip(raw["layers"], raw["ieconvs"])):
        din, dout = dims[i], dims[i + 1]
        h = din // 4
        # GRGC weight: rows laid out per relation block of 128 padded lanes.
        wg = jnp.zeros((num_relation * P, P), jnp.float32)
        for r in range(num_relation):
            wg = wg.at[r * P:r * P + din, :dout].set(lp["w"][r * din:(r + 1) * din, :])
        bg = jnp.zeros((P,), jnp.float32).at[:dout].set(lp["b"])
        # IEConv: input_bn + message_bn folded into (w1, b1); update_bn + output_bn into (w2, b2).
        w1 = jnp.zeros((P, h), jnp.float32).at[:din, :].set(ip["w1"] * (s * s))
        b1 = ip["b1"] * s
        w2 = jnp.zeros((h, P), jnp.float32).at[:, :dout].set(ip["w2"] * (s * s))
        b2 = jnp.zeros((P,), jnp.float32).at[:dout].set(ip["b2"] * s)
        kw2, kb2 = ip["kw2"], ip["kb2"]
        # Constant selection matrices for the per-edge einsum (hoisted out of kernels).
        col = jnp.arange(h * h)
        kk = jnp.arange(h)
        T = (kk[:, None] == (col[None, :] % h)).astype(jnp.float32)   # [h, h*h]
        S = ((col[:, None] // h) == kk[None, :]).astype(jnp.float32)  # [h*h, h]
        layers.append({
            "wg": wg, "bg": bg,
            "w1": w1, "b1": b1, "w2": w2, "b2": b2,
            "kw1": ip["kw1"], "kb1": ip["kb1"],
            "kw2b": kw2[:, :h], "kb2b": kb2[:h],
            "kw2m": kw2[:, h:], "kb2m": kb2[h:],
            "T": T, "S": S,
        })
    return {"emb_w": emb_w, "emb_b": emb_b, "layers": layers}


def build_graph(key, num_node, num_edge, num_relation, num_graphs):
    nodes_per_graph = num_node // num_graphs
    edges_per_graph = num_edge // num_graphs
    e = jnp.arange(num_edge)
    g = e // edges_per_graph
    node_in = g * nodes_per_graph + (e * 5) % nodes_per_graph
    node_out = g * nodes_per_graph + (e * 7 + 3) % nodes_per_graph
    rel = e % num_relation
    edge_list = jnp.stack([node_in, node_out, rel], axis=1).astype(jnp.int32)
    edge_weight = jnp.linspace(0.5, 1.5, num_edge).astype(jnp.float32)
    node2graph = (jnp.arange(num_node) // nodes_per_graph).astype(jnp.int32)
    node_position = jax.random.normal(key, (num_node, 3), jnp.float32)
    bead2residue = (jnp.arange(num_node) // 3).astype(jnp.int32)
    return {
        "edge_list": edge_list,
        "edge_weight": edge_weight,
        "node2graph": node2graph,
        "node_position": node_position,
        "bead2residue": bead2residue,
    }


if __name__ == "__main__":
    INPUT_DIM = 16
    EMBEDDING_DIM = 32
    HIDDEN_DIMS = [32, 32]
    NUM_RELATION = 3
    NUM_NODE, NUM_EDGE, NUM_GRAPHS = 24, 48, 2

    root = jax.random.PRNGKey(0)
    k_param, k_graph, k_x = jax.random.split(root, 3)

    raw_params = build_params(k_param, INPUT_DIM, EMBEDDING_DIM, HIDDEN_DIMS, NUM_RELATION)
    params = prepare_params(raw_params, input_dim=INPUT_DIM, embedding_dim=EMBEDDING_DIM,
                            hidden_dims=HIDDEN_DIMS, num_relation=NUM_RELATION)
    graph = build_graph(k_graph, NUM_NODE, NUM_EDGE, NUM_RELATION, NUM_GRAPHS)
    x = jax.random.normal(k_x, (NUM_NODE, INPUT_DIM), jnp.float32)

    fwd = make_forward(input_dim=INPUT_DIM, embedding_dim=EMBEDDING_DIM,
                       hidden_dims=HIDDEN_DIMS, num_relation=NUM_RELATION,
                       num_node=NUM_NODE, num_edge=NUM_EDGE, num_graphs=NUM_GRAPHS,
                       short_cut=True)
    out = jax.block_until_ready(fwd(params, graph, x))

    assert out["node_feature"].shape == (NUM_NODE, HIDDEN_DIMS[-1])
    assert out["graph_feature"].shape == (NUM_GRAPHS, HIDDEN_DIMS[-1])
    assert bool(jnp.all(jnp.isfinite(out["node_feature"])))
    assert bool(jnp.all(jnp.isfinite(out["graph_feature"])))
    print("KERNEL_OK")
</pallas_src>

<mosaic_0001>
module attributes {stable_mosaic.version = 11 : i64} {
  func.func @_linear_kernel(%arg0: i32, %arg1: memref<24x16xf32, #tpu.memory_space<vmem>>, %arg2: memref<16x128xf32, #tpu.memory_space<vmem>>, %arg3: memref<1x128xf32, #tpu.memory_space<vmem>>, %arg4: memref<24x128xf32, #tpu.memory_space<vmem>>) attributes {dimension_semantics = [#tpu.dimension_semantics<parallel>], iteration_bounds = array<i64: 1>, scalar_prefetch = 0 : i64, scratch_operands = 0 : i64, tpu.core_type = #tpu.core_type<tc>, window_params = [{transform_indices = @transform_0, window_bounds = array<i64: 24, 16>}, {pipeline_mode = #tpu.pipeline_mode<synchronous>, transform_indices = @transform_1, window_bounds = array<i64: 16, 128>}, {pipeline_mode = #tpu.pipeline_mode<synchronous>, transform_indices = @transform_2, window_bounds = array<i64: 1, 128>}, {transform_indices = @transform_3, window_bounds = array<i64: 24, 128>}]} {
    %c0 = arith.constant 0 : index
    %c0_0 = arith.constant 0 : index
    %0 = vector.load %arg1[%c0, %c0_0] : memref<24x16xf32, #tpu.memory_space<vmem>>, vector<24x16xf32>
    %c0_1 = arith.constant 0 : index
    %c0_2 = arith.constant 0 : index
    %1 = vector.load %arg2[%c0_1, %c0_2] : memref<16x128xf32, #tpu.memory_space<vmem>>, vector<16x128xf32>
    %cst = arith.constant dense<0.000000e+00> : vector<24x128xf32>
    %2 = tpu.matmul %0, %1, %cst {dimension_numbers = #tpu.dot_dimension_numbers<[1], [0], [0], [1], [0, 0, 1, 1], [], []>} : vector<24x16xf32>, vector<16x128xf32>, vector<24x128xf32> -> vector<24x128xf32>
    %c0_3 = arith.constant 0 : index
    %c0_4 = arith.constant 0 : index
    %3 = vector.load %arg3[%c0_3, %c0_4] : memref<1x128xf32, #tpu.memory_space<vmem>>, vector<1x128xf32>
    %4 = vector.broadcast %3 : vector<1x128xf32> to vector<24x128xf32>
    %5 = arith.addf %2, %4 : vector<24x128xf32>
    %c0_5 = arith.constant 0 : index
    %c0_6 = arith.constant 0 : index
    %6 = vector.load %arg4[%c0_5, %c0_6] : memref<24x128xf32, #tpu.memory_space<vmem>>, vector<24x128xf32>
    tpu.vector_store %arg4[%c0_5, %c0_6], %5 {strides = array<i32>} : memref<24x128xf32, #tpu.memory_space<vmem>>, vector<24x128xf32>,
    return
  }
  func.func @transform_0(%arg0: i32) -> (i32, i32) {
    %c0_i32 = arith.constant 0 : i32
    %c0_i32_0 = arith.constant 0 : i32
    return %arg0, %c0_i32 : i32, i32
  }
  func.func @transform_1(%arg0: i32) -> (i32, i32) {
    %c0_i32 = arith.constant 0 : i32
    %c0_i32_0 = arith.constant 0 : i32
    %c0_i32_1 = arith.constant 0 : i32
    return %c0_i32, %c0_i32_0 : i32, i32
  }
  func.func @transform_2(%arg0: i32) -> (i32, i32) {
    %c0_i32 = arith.constant 0 : i32
    %c0_i32_0 = arith.constant 0 : i32
    %c0_i32_1 = arith.constant 0 : i32
    return %c0_i32, %c0_i32_0 : i32, i32
  }
  func.func @transform_3(%arg0: i32) -> (i32, i32) {
    %c0_i32 = arith.constant 0 : i32
    %c0_i32_0 = arith.constant 0 : i32
    return %arg0, %c0_i32 : i32, i32
  }
}

module attributes {stable_mosaic.version = 11 : i64} {
  func.func @_ieconv_edge_kernel(%arg0: i32, %arg1: memref<48x128xf32, #tpu.memory_space<vmem>>, %arg2: memref<48x14xf32, #tpu.memory_space<vmem>>, %arg3: memref<128x8xf32, #tpu.memory_space<vmem>>, %arg4: memref<1x8xf32, #tpu.memory_space<vmem>>, %arg5: memref<14x32xf32, #tpu.memory_space<vmem>>, %arg6: memref<1x32xf32, #tpu.memory_space<vmem>>, %arg7: memref<32x8xf32, #tpu.memory_space<vmem>>, %arg8: memref<1x8xf32, #tpu.memory_space<vmem>>, %arg9: memref<32x64xf32, #tpu.memory_space<vmem>>, %arg10: memref<1x64xf32, #tpu.memory_space<vmem>>, %arg11: memref<8x64xf32, #tpu.memory_space<vmem>>, %arg12: memref<64x8xf32, #tpu.memory_space<vmem>>, %arg13: memref<48x8xf32, #tpu.memory_space<vmem>>) attributes {dimension_semantics = [#tpu.dimension_semantics<parallel>], iteration_bounds = array<i64: 1>, scalar_prefetch = 0 : i64, scratch_operands = 0 : i64, tpu.core_type = #tpu.core_type<tc>, window_params = [{transform_indices = @transform_0, window_bounds = array<i64: 48, 128>}, {transform_indices = @transform_1, window_bounds = array<i64: 48, 14>}, {pipeline_mode = #tpu.pipeline_mode<synchronous>, transform_indices = @transform_2, window_bounds = array<i64: 128, 8>}, {pipeline_mode = #tpu.pipeline_mode<synchronous>, transform_indices = @transform_3, window_bounds = array<i64: 1, 8>}, {pipeline_mode = #tpu.pipeline_mode<synchronous>, transform_indices = @transform_4, window_bounds = array<i64: 14, 32>}, {pipeline_mode = #tpu.pipeline_mode<synchronous>, transform_indices = @transform_5, window_bounds = array<i64: 1, 32>}, {pipeline_mode = #tpu.pipeline_mode<synchronous>, transform_indices = @transform_6, window_bounds = array<i64: 32, 8>}, {pipeline_mode = #tpu.pipeline_mode<synchronous>, transform_indices = @transform_7, window_bounds = array<i64: 1, 8>}, {pipeline_mode = #tpu.pipeline_mode<synchronous>, transform_indices = @transform_8, window_bounds = array<i64: 32, 64>}, {pipeline_mode = #tpu.pipeline_mode<synchronous>, transform_indices = @transform_9, window_bounds = array<i64: 1, 64>}, {pipeline_mode = #tpu.pipeline_mode<synchronous>, transform_indices = @transform_10, window_bounds = array<i64: 8, 64>}, {pipeline_mode = #tpu.pipeline_mode<synchronous>, transform_indices = @transform_11, window_bounds = array<i64: 64, 8>}, {transform_indices = @transform_12, window_bounds = array<i64: 48, 8>}]} {
    %c0 = arith.constant 0 : index
    %c0_0 = arith.constant 0 : index
    %0 = vector.load %arg1[%c0, %c0_0] : memref<48x128xf32, #tpu.memory_space<vmem>>, vector<48x128xf32>
    %cst = arith.constant 0.000000e+00 : f32
    %1 = vector.broadcast %cst : f32 to vector<48x128xf32>
    %2 = arith.maximumf %0, %1 : vector<48x128xf32>
    %c0_1 = arith.constant 0 : index
    %c0_2 = arith.constant 0 : index
    %3 = vector.load %arg3[%c0_1, %c0_2] : memref<128x8xf32, #tpu.memory_space<vmem>>, vector<128x8xf32>
    %cst_3 = arith.constant dense<0.000000e+00> : vector<48x8xf32>
    %4 = tpu.matmul %2, %3, %cst_3 {dimension_numbers = #tpu.dot_dimension_numbers<[1], [0], [0], [1], [0, 0, 1, 1], [], []>} : vector<48x128xf32>, vector<128x8xf32>, vector<48x8xf32> -> vector<48x8xf32>
    %c0_4 = arith.constant 0 : index
    %c0_5 = arith.constant 0 : index
    %5 = vector.load %arg4[%c0_4, %c0_5] : memref<1x8xf32, #tpu.memory_space<vmem>>, vector<1x8xf32>
    %6 = vector.broadcast %5 : vector<1x8xf32> to vector<48x8xf32>
    %7 = arith.addf %4, %6 : vector<48x8xf32>
    %cst_6 = arith.constant 0.000000e+00 : f32
    %8 = vector.broadcast %cst_6 : f32 to vector<48x8xf32>
    %9 = arith.maximumf %7, %8 : vector<48x8xf32>
    %c0_7 = arith.constant 0 : index
    %c0_8 = arith.constant 0 : index
    %10 = vector.load %arg2[%c0_7, %c0_8] : memref<48x14xf32, #tpu.memory_space<vmem>>, vector<48x14xf32>
    %c0_9 = arith.constant 0 : index
    %c0_10 = arith.constant 0 : index
    %11 = vector.load %arg5[%c0_9, %c0_10] : memref<14x32xf32, #tpu.memory_space<vmem>>, vector<14x32xf32>
    %cst_11 = arith.constant dense<0.000000e+00> : vector<48x32xf32>
    %12 = tpu.matmul %10, %11, %cst_11 {dimension_numbers = #tpu.dot_dimension_numbers<[1], [0], [0], [1], [0, 0, 1, 1], [], []>} : vector<48x14xf32>, vector<14x32xf32>, vector<48x32xf32> -> vector<48x32xf32>
    %c0_12 = arith.constant 0 : index
    %c0_13 = arith.constant 0 : index
    %13 = vector.load %arg6[%c0_12, %c0_13] : memref<1x32xf32, #tpu.memory_space<vmem>>, vector<1x32xf32>
    %14 = vector.broadcast %13 : vector<1x32xf32> to vector<48x32xf32>
    %15 = arith.addf %12, %14 : vector<48x32xf32>
    %cst_14 = arith.constant 0.000000e+00 : f32
    %16 = vector.broadcast %cst_14 : f32 to vector<48x32xf32>
    %17 = arith.maximumf %15, %16 : vector<48x32xf32>
    %c0_15 = arith.constant 0 : index
    %c0_16 = arith.constant 0 : index
    %18 = vector.load %arg7[%c0_15, %c0_16] : memref<32x8xf32, #tpu.memory_space<vmem>>, vector<32x8xf32>
    %cst_17 = arith.constant dense<0.000000e+00> : vector<48x8xf32>
    %19 = tpu.matmul %17, %18, %cst_17 {dimension_numbers = #tpu.dot_dimension_numbers<[1], [0], [0], [1], [0, 0, 1, 1], [], []>} : vector<48x32xf32>, vector<32x8xf32>, vector<48x8xf32> -> vector<48x8xf32>
    %c0_18 = arith.constant 0 : index
    %c0_19 = arith.constant 0 : index
    %20 = vector.load %arg8[%c0_18, %c0_19] : memref<1x8xf32, #tpu.memory_space<vmem>>, vector<1x8xf32>
    %21 = vector.broadcast %20 : vector<1x8xf32> to vector<48x8xf32>
    %22 = arith.addf %19, %21 : vector<48x8xf32>
    %c0_20 = arith.constant 0 : index
    %c0_21 = arith.constant 0 : index
    %23 = vector.load %arg9[%c0_20, %c0_21] : memref<32x64xf32, #tpu.memory_space<vmem>>, vector<32x64xf32>
    %cst_22 = arith.constant dense<0.000000e+00> : vector<48x64xf32>
    %24 = tpu.matmul %17, %23, %cst_22 {dimension_numbers = #tpu.dot_dimension_numbers<[1], [0], [0], [1], [0, 0, 1, 1], [], []>} : vector<48x32xf32>, vector<32x64xf32>, vector<48x64xf32> -> vector<48x64xf32>
    %c0_23 = arith.constant 0 : index
    %c0_24 = arith.constant 0 : index
    %25 = vector.load %arg10[%c0_23, %c0_24] : memref<1x64xf32, #tpu.memory_space<vmem>>, vector<1x64xf32>
    %26 = vector.broadcast %25 : vector<1x64xf32> to vector<48x64xf32>
    %27 = arith.addf %24, %26 : vector<48x64xf32>
    %c0_25 = arith.constant 0 : index
    %c0_26 = arith.constant 0 : index
    %28 = vector.load %arg11[%c0_25, %c0_26] : memref<8x64xf32, #tpu.memory_space<vmem>>, vector<8x64xf32>
    %cst_27 = arith.constant dense<0.000000e+00> : vector<48x64xf32>
    %29 = tpu.matmul %9, %28, %cst_27 {dimension_numbers = #tpu.dot_dimension_numbers<[1], [0], [0], [1], [0, 0, 1, 1], [], []>} : vector<48x8xf32>, vector<8x64xf32>, vector<48x64xf32> -> vector<48x64xf32>
    %30 = arith.mulf %27, %29 : vector<48x64xf32>
    %c0_28 = arith.constant 0 : index
    %c0_29 = arith.constant 0 : index
    %31 = vector.load %arg12[%c0_28, %c0_29] : memref<64x8xf32, #tpu.memory_space<vmem>>, vector<64x8xf32>
    %cst_30 = arith.constant dense<0.000000e+00> : vector<48x8xf32>
    %32 = tpu.matmul %30, %31, %cst_30 {dimension_numbers = #tpu.dot_dimension_numbers<[1], [0], [0], [1], [0, 0, 1, 1], [], []>} : vector<48x64xf32>, vector<64x8xf32>, vector<48x8xf32> -> vector<48x8xf32>
    %33 = arith.addf %32, %22 : vector<48x8xf32>
    %c0_31 = arith.constant 0 : index
    %c0_32 = arith.constant 0 : index
    %34 = vector.load %arg13[%c0_31, %c0_32] : memref<48x8xf32, #tpu.memory_space<vmem>>, vector<48x8xf32>
    tpu.vector_store %arg13[%c0_31, %c0_32], %33 {strides = array<i32>} : memref<48x8xf32, #tpu.memory_space<vmem>>, vector<48x8xf32>,
    return
  }
  func.func @transform_0(%arg0: i32) -> (i32, i32) {
    %c0_i32 = arith.constant 0 : i32
    %c0_i32_0 = arith.constant 0 : i32
    return %arg0, %c0_i32 : i32, i32
  }
  func.func @transform_1(%arg0: i32) -> (i32, i32) {
    %c0_i32 = arith.constant 0 : i32
    %c0_i32_0 = arith.constant 0 : i32
    return %arg0, %c0_i32 : i32, i32
  }
  func.func @transform_2(%arg0: i32) -> (i32, i32) {
    %c0_i32 = arith.constant 0 : i32
    %c0_i32_0 = arith.constant 0 : i32
    %c0_i32_1 = arith.constant 0 : i32
    return %c0_i32, %c0_i32_0 : i32, i32
  }
  func.func @transform_3(%arg0: i32) -> (i32, i32) {
    %c0_i32 = arith.constant 0 : i32
    %c0_i32_0 = arith.constant 0 : i32
    %c0_i32_1 = arith.constant 0 : i32
    return %c0_i32, %c0_i32_0 : i32, i32
  }
  func.func @transform_4(%arg0: i32) -> (i32, i32) {
    %c0_i32 = arith.constant 0 : i32
    %c0_i32_0 = arith.constant 0 : i32
    %c0_i32_1 = arith.constant 0 : i32
    return %c0_i32, %c0_i32_0 : i32, i32
  }
  func.func @transform_5(%arg0: i32) -> (i32, i32) {
    %c0_i32 = arith.constant 0 : i32
    %c0_i32_0 = arith.constant 0 : i32
    %c0_i32_1 = arith.constant 0 : i32
    return %c0_i32, %c0_i32_0 : i32, i32
  }
  func.func @transform_6(%arg0: i32) -> (i32, i32) {
    %c0_i32 = arith.constant 0 : i32
    %c0_i32_0 = arith.constant 0 : i32
    %c0_i32_1 = arith.constant 0 : i32
    return %c0_i32, %c0_i32_0 : i32, i32
  }
  func.func @transform_7(%arg0: i32) -> (i32, i32) {
    %c0_i32 = arith.constant 0 : i32
    %c0_i32_0 = arith.constant 0 : i32
    %c0_i32_1 = arith.constant 0 : i32
    return %c0_i32, %c0_i32_0 : i32, i32
  }
  func.func @transform_8(%arg0: i32) -> (i32, i32) {
    %c0_i32 = arith.constant 0 : i32
    %c0_i32_0 = arith.constant 0 : i32
    %c0_i32_1 = arith.constant 0 : i32
    return %c0_i32, %c0_i32_0 : i32, i32
  }
  func.func @transform_9(%arg0: i32) -> (i32, i32) {
    %c0_i32 = arith.constant 0 : i32
    %c0_i32_0 = arith.constant 0 : i32
    %c0_i32_1 = arith.constant 0 : i32
    return %c0_i32, %c0_i32_0 : i32, i32
  }
  func.func @transform_10(%arg0: i32) -> (i32, i32) {
    %c0_i32 = arith.constant 0 : i32
    %c0_i32_0 = arith.constant 0 : i32
    %c0_i32_1 = arith.constant 0 : i32
    return %c0_i32, %c0_i32_0 : i32, i32
  }
  func.func @transform_11(%arg0: i32) -> (i32, i32) {
    %c0_i32 = arith.constant 0 : i32
    %c0_i32_0 = arith.constant 0 : i32
    %c0_i32_1 = arith.constant 0 : i32
    return %c0_i32, %c0_i32_0 : i32, i32
  }
  func.func @transform_12(%arg0: i32) -> (i32, i32) {
    %c0_i32 = arith.constant 0 : i32
    %c0_i32_0 = arith.constant 0 : i32
    return %arg0, %c0_i32 : i32, i32
  }
}

module attributes {stable_mosaic.version = 11 : i64} {
  func.func @_grgc_kernel(%arg0: i32, %arg1: i32, %arg2: memref<1x48xi32, #tpu.memory_space<vmem>>, %arg3: memref<1x48xi32, #tpu.memory_space<vmem>>, %arg4: memref<1x48xf32, #tpu.memory_space<vmem>>, %arg5: memref<48x128xf32, #tpu.memory_space<vmem>>, %arg6: memref<384x128xf32, #tpu.memory_space<vmem>>, %arg7: memref<1x128xf32, #tpu.memory_space<vmem>>, %arg8: memref<24x128xf32, #tpu.memory_space<vmem>>, %arg9: memref<24x384xf32, #tpu.memory_space<vmem>>) attributes {dimension_semantics = [#tpu.dimension_semantics<parallel>, #tpu.dimension_semantics<arbitrary>], iteration_bounds = array<i64: 1, 1>, scalar_prefetch = 0 : i64, scratch_operands = 1 : i64, tpu.core_type = #tpu.core_type<tc>, window_params = [{transform_indices = @transform_0, window_bounds = array<i64: 1, 48>}, {transform_indices = @transform_1, window_bounds = array<i64: 1, 48>}, {transform_indices = @transform_2, window_bounds = array<i64: 1, 48>}, {transform_indices = @transform_3, window_bounds = array<i64: 48, 128>}, {pipeline_mode = #tpu.pipeline_mode<synchronous>, transform_indices = @transform_4, window_bounds = array<i64: 384, 128>}, {pipeline_mode = #tpu.pipeline_mode<synchronous>, transform_indices = @transform_5, window_bounds = array<i64: 1, 128>}, {transform_indices = @transform_6, window_bounds = array<i64: 24, 128>}]} {
    %c0_i32 = arith.constant 0 : i32
    %0 = arith.cmpi eq, %arg1, %c0_i32 : i32
    %1 = arith.extui %0 : i1 to i32
    %c0_i32_0 = arith.constant 0 : i32
    %2 = arith.cmpi ne, %1, %c0_i32_0 : i32
    scf.if %2 {
      %cst_26 = arith.constant 0.000000e+00 : f32
      %52 = vector.broadcast %cst_26 : f32 to vector<24x384xf32>
      %c0_27 = arith.constant 0 : index
      %c0_28 = arith.constant 0 : index
      %53 = vector.load %arg9[%c0_27, %c0_28] : memref<24x384xf32, #tpu.memory_space<vmem>>, vector<24x384xf32>
      tpu.vector_store %arg9[%c0_27, %c0_28], %52 {strides = array<i32>} : memref<24x384xf32, #tpu.memory_space<vmem>>, vector<24x384xf32>,
    } else {
    }
    %c0 = arith.constant 0 : index
    %c0_1 = arith.constant 0 : index
    %3 = vector.load %arg2[%c0, %c0_1] : memref<1x48xi32, #tpu.memory_space<vmem>>, vector<1x48xi32>
    %c0_2 = arith.constant 0 : index
    %c0_3 = arith.constant 0 : index
    %4 = vector.load %arg3[%c0_2, %c0_3] : memref<1x48xi32, #tpu.memory_space<vmem>>, vector<1x48xi32>
    %c0_4 = arith.constant 0 : index
    %c0_5 = arith.constant 0 : index
    %5 = vector.load %arg4[%c0_4, %c0_5] : memref<1x48xf32, #tpu.memory_space<vmem>>, vector<1x48xf32>
    %c0_6 = arith.constant 0 : index
    %c0_7 = arith.constant 0 : index
    %6 = vector.load %arg5[%c0_6, %c0_7] : memref<48x128xf32, #tpu.memory_space<vmem>>, vector<48x128xf32>
    %7 = tpu.iota {dimensions = array<i32: 0>} : vector<24x48xi32>
    %c24_i32 = arith.constant 24 : i32
    %8 = arith.muli %arg0, %c24_i32 : i32
    %9 = vector.broadcast %8 : i32 to vector<24x48xi32>
    %10 = arith.addi %7, %9 : vector<24x48xi32>
    %11 = vector.broadcast %3 : vector<1x48xi32> to vector<24x48xi32>
    %12 = arith.cmpi eq, %10, %11 : vector<24x48xi32>
    %c0_i32_8 = arith.constant 0 : i32
    %13 = vector.broadcast %c0_i32_8 : i32 to vector<1x48xi32>
    %14 = arith.cmpi eq, %4, %13 : vector<1x48xi32>
    %15 = vector.broadcast %14 : vector<1x48xi1> to vector<24x48xi1>
    %16 = arith.andi %12, %15 : vector<24x48xi1>
    %cst = arith.constant 0.000000e+00 : f32
    %17 = vector.shape_cast %5 : vector<1x48xf32> to vector<1x48xf32>
    %18 = vector.broadcast %17 : vector<1x48xf32> to vector<24x48xf32>
    %19 = vector.broadcast %cst : f32 to vector<24x48xf32>
    %20 = arith.select %16, %18, %19 : vector<24x48xi1>, vector<24x48xf32>
    %c0_9 = arith.constant 0 : index
    %c0_10 = arith.constant 0 : index
    %21 = vector.load %arg9[%c0_9, %c0_10] : memref<24x384xf32, #tpu.memory_space<vmem>>, vector<24x128xf32>
    %cst_11 = arith.constant dense<0.000000e+00> : vector<24x128xf32>
    %22 = tpu.matmul %20, %6, %cst_11 {dimension_numbers = #tpu.dot_dimension_numbers<[1], [0], [0], [1], [0, 0, 1, 1], [], []>} : vector<24x48xf32>, vector<48x128xf32>, vector<24x128xf32> -> vector<24x128xf32>
    %23 = arith.addf %21, %22 : vector<24x128xf32>
    %c0_12 = arith.constant 0 : index
    %c0_13 = arith.constant 0 : index
    %24 = vector.load %arg9[%c0_12, %c0_13] : memref<24x384xf32, #tpu.memory_space<vmem>>, vector<24x128xf32>
    tpu.vector_store %arg9[%c0_12, %c0_13], %23 {strides = array<i32>} : memref<24x384xf32, #tpu.memory_space<vmem>>, vector<24x128xf32>,
    %c1_i32 = arith.constant 1 : i32
    %25 = vector.broadcast %c1_i32 : i32 to vector<1x48xi32>
    %26 = arith.cmpi eq, %4, %25 : vector<1x48xi32>
    %27 = vector.broadcast %26 : vector<1x48xi1> to vector<24x48xi1>
    %28 = arith.andi %12, %27 : vector<24x48xi1>
    %cst_14 = arith.constant 0.000000e+00 : f32
    %29 = vector.shape_cast %5 : vector<1x48xf32> to vector<1x48xf32>
    %30 = vector.broadcast %29 : vector<1x48xf32> to vector<24x48xf32>
    %31 = vector.broadcast %cst_14 : f32 to vector<24x48xf32>
    %32 = arith.select %28, %30, %31 : vector<24x48xi1>, vector<24x48xf32>
    %c0_15 = arith.constant 0 : index
    %c128 = arith.constant 128 : index
    %33 = vector.load %arg9[%c0_15, %c128] : memref<24x384xf32, #tpu.memory_space<vmem>>, vector<24x128xf32>
    %cst_16 = arith.constant dense<0.000000e+00> : vector<24x128xf32>
    %34 = tpu.matmul %32, %6, %cst_16 {dimension_numbers = #tpu.dot_dimension_numbers<[1], [0], [0], [1], [0, 0, 1, 1], [], []>} : vector<24x48xf32>, vector<48x128xf32>, vector<24x128xf32> -> vector<24x128xf32>
    %35 = arith.addf %33, %34 : vector<24x128xf32>
    %c0_17 = arith.constant 0 : index
    %c128_18 = arith.constant 128 : index
    %36 = vector.load %arg9[%c0_17, %c128_18] : memref<24x384xf32, #tpu.memory_space<vmem>>, vector<24x128xf32>
    tpu.vector_store %arg9[%c0_17, %c128_18], %35 {strides = array<i32>} : memref<24x384xf32, #tpu.memory_space<vmem>>, vector<24x128xf32>,
    %c2_i32 = arith.constant 2 : i32
    %37 = vector.broadcast %c2_i32 : i32 to vector<1x48xi32>
    %38 = arith.cmpi eq, %4, %37 : vector<1x48xi32>
    %39 = vector.broadcast %38 : vector<1x48xi1> to vector<24x48xi1>
    %40 = arith.andi %12, %39 : vector<24x48xi1>
    %cst_19 = arith.constant 0.000000e+00 : f32
    %41 = vector.shape_cast %5 : vector<1x48xf32> to vector<1x48xf32>
    %42 = vector.broadcast %41 : vector<1x48xf32> to vector<24x48xf32>
    %43 = vector.broadcast %cst_19 : f32 to vector<24x48xf32>
    %44 = arith.select %40, %42, %43 : vector<24x48xi1>, vector<24x48xf32>
    %c0_20 = arith.constant 0 : index
    %c256 = arith.constant 256 : index
    %45 = vector.load %arg9[%c0_20, %c256] : memref<24x384xf32, #tpu.memory_space<vmem>>, vector<24x128xf32>
    %cst_21 = arith.constant dense<0.000000e+00> : vector<24x128xf32>
    %46 = tpu.matmul %44, %6, %cst_21 {dimension_numbers = #tpu.dot_dimension_numbers<[1], [0], [0], [1], [0, 0, 1, 1], [], []>} : vector<24x48xf32>, vector<48x128xf32>, vector<24x128xf32> -> vector<24x128xf32>
    %47 = arith.addf %45, %46 : vector<24x128xf32>
    %c0_22 = arith.constant 0 : index
    %c256_23 = arith.constant 256 : index
    %48 = vector.load %arg9[%c0_22, %c256_23] : memref<24x384xf32, #tpu.memory_space<vmem>>, vector<24x128xf32>
    tpu.vector_store %arg9[%c0_22, %c256_23], %47 {strides = array<i32>} : memref<24x384xf32, #tpu.memory_space<vmem>>, vector<24x128xf32>,
    %c0_i32_24 = arith.constant 0 : i32
    %49 = arith.cmpi eq, %arg1, %c0_i32_24 : i32
    %50 = arith.extui %49 : i1 to i32
    %c0_i32_25 = arith.constant 0 : i32
    %51 = arith.cmpi ne, %50, %c0_i32_25 : i32
    scf.if %51 {
      %c0_26 = arith.constant 0 : index
      %c0_27 = arith.constant 0 : index
      %52 = vector.load %arg9[%c0_26, %c0_27] : memref<24x384xf32, #tpu.memory_space<vmem>>, vector<24x384xf32>
      %c0_28 = arith.constant 0 : index
      %c0_29 = arith.constant 0 : index
      %53 = vector.load %arg6[%c0_28, %c0_29] : memref<384x128xf32, #tpu.memory_space<vmem>>, vector<384x128xf32>
      %cst_30 = arith.constant dense<0.000000e+00> : vector<24x128xf32>
      %54 = tpu.matmul %52, %53, %cst_30 {dimension_numbers = #tpu.dot_dimension_numbers<[1], [0], [0], [1], [0, 0, 1, 1], [], []>} : vector<24x384xf32>, vector<384x128xf32>, vector<24x128xf32> -> vector<24x128xf32>
      %c0_31 = arith.constant 0 : index
      %c0_32 = arith.constant 0 : index
      %55 = vector.load %arg7[%c0_31, %c0_32] : memref<1x128xf32, #tpu.memory_space<vmem>>, vector<1x128xf32>
      %56 = vector.broadcast %55 : vector<1x128xf32> to vector<24x128xf32>
      %57 = arith.addf %54, %56 : vector<24x128xf32>
      %cst_33 = arith.constant 0.000000e+00 : f32
      %58 = vector.broadcast %cst_33 : f32 to vector<24x128xf32>
      %59 = arith.maximumf %57, %58 : vector<24x128xf32>
      %c0_34 = arith.constant 0 : index
      %c0_35 = arith.constant 0 : index
      %60 = vector.load %arg8[%c0_34, %c0_35] : memref<24x128xf32, #tpu.memory_space<vmem>>, vector<24x128xf32>
      tpu.vector_store %arg8[%c0_34, %c0_35], %59 {strides = array<i32>} : memref<24x128xf32, #tpu.memory_space<vmem>>, vector<24x128xf32>,
    } else {
    }
    return
  }
  func.func @transform_0(%arg0: i32, %arg1: i32) -> (i32, i32) {
    %c0_i32 = arith.constant 0 : i32
    %c0_i32_0 = arith.constant 0 : i32
    return %c0_i32, %arg1 : i32, i32
  }
  func.func @transform_1(%arg0: i32, %arg1: i32) -> (i32, i32) {
    %c0_i32 = arith.constant 0 : i32
    %c0_i32_0 = arith.constant 0 : i32
    return %c0_i32, %arg1 : i32, i32
  }
  func.func @transform_2(%arg0: i32, %arg1: i32) -> (i32, i32) {
    %c0_i32 = arith.constant 0 : i32
    %c0_i32_0 = arith.constant 0 : i32
    return %c0_i32, %arg1 : i32, i32
  }
  func.func @transform_3(%arg0: i32, %arg1: i32) -> (i32, i32) {
    %c0_i32 = arith.constant 0 : i32
    %c0_i32_0 = arith.constant 0 : i32
    return %arg1, %c0_i32 : i32, i32
  }
  func.func @transform_4(%arg0: i32, %arg1: i32) -> (i32, i32) {
    %c0_i32 = arith.constant 0 : i32
    %c0_i32_0 = arith.constant 0 : i32
    %c0_i32_1 = arith.constant 0 : i32
    return %c0_i32, %c0_i32_0 : i32, i32
  }
  func.func @transform_5(%arg0: i32, %arg1: i32) -> (i32, i32) {
    %c0_i32 = arith.constant 0 : i32
    %c0_i32_0 = arith.constant 0 : i32
    %c0_i32_1 = arith.constant 0 : i32
    return %c0_i32, %c0_i32_0 : i32, i32
  }
  func.func @transform_6(%arg0: i32, %arg1: i32) -> (i32, i32) {
    %c0_i32 = arith.constant 0 : i32
    %c0_i32_0 = arith.constant 0 : i32
    return %arg0, %c0_i32 : i32, i32
  }
}

module attributes {stable_mosaic.version = 11 : i64} {
  func.func @_ieconv_combine_kernel(%arg0: i32, %arg1: i32, %arg2: memref<1x48xi32, #tpu.memory_space<vmem>>, %arg3: memref<1x48xf32, #tpu.memory_space<vmem>>, %arg4: memref<48x8xf32, #tpu.memory_space<vmem>>, %arg5: memref<8x128xf32, #tpu.memory_space<vmem>>, %arg6: memref<1x128xf32, #tpu.memory_space<vmem>>, %arg7: memref<24x128xf32, #tpu.memory_space<vmem>>, %arg8: memref<24x128xf32, #tpu.memory_space<vmem>>, %arg9: memref<24x128xf32, #tpu.memory_space<vmem>>, %arg10: memref<24x8xf32, #tpu.memory_space<vmem>>) attributes {dimension_semantics = [#tpu.dimension_semantics<parallel>, #tpu.dimension_semantics<arbitrary>], iteration_bounds = array<i64: 1, 1>, scalar_prefetch = 0 : i64, scratch_operands = 1 : i64, tpu.core_type = #tpu.core_type<tc>, window_params = [{transform_indices = @transform_0, window_bounds = array<i64: 1, 48>}, {transform_indices = @transform_1, window_bounds = array<i64: 1, 48>}, {transform_indices = @transform_2, window_bounds = array<i64: 48, 8>}, {pipeline_mode = #tpu.pipeline_mode<synchronous>, transform_indices = @transform_3, window_bounds = array<i64: 8, 128>}, {pipeline_mode = #tpu.pipeline_mode<synchronous>, transform_indices = @transform_4, window_bounds = array<i64: 1, 128>}, {transform_indices = @transform_5, window_bounds = array<i64: 24, 128>}, {transform_indices = @transform_6, window_bounds = array<i64: 24, 128>}, {transform_indices = @transform_7, window_bounds = array<i64: 24, 128>}]} {
    %c0_i32 = arith.constant 0 : i32
    %0 = arith.cmpi eq, %arg1, %c0_i32 : i32
    %1 = arith.extui %0 : i1 to i32
    %c0_i32_0 = arith.constant 0 : i32
    %2 = arith.cmpi ne, %1, %c0_i32_0 : i32
    scf.if %2 {
      %cst_13 = arith.constant 0.000000e+00 : f32
      %23 = vector.broadcast %cst_13 : f32 to vector<24x8xf32>
      %c0_14 = arith.constant 0 : index
      %c0_15 = arith.constant 0 : index
      %24 = vector.load %arg10[%c0_14, %c0_15] : memref<24x8xf32, #tpu.memory_space<vmem>>, vector<24x8xf32>
      tpu.vector_store %arg10[%c0_14, %c0_15], %23 {strides = array<i32>} : memref<24x8xf32, #tpu.memory_space<vmem>>, vector<24x8xf32>,
    } else {
    }
    %c0 = arith.constant 0 : index
    %c0_1 = arith.constant 0 : index
    %3 = vector.load %arg2[%c0, %c0_1] : memref<1x48xi32, #tpu.memory_space<vmem>>, vector<1x48xi32>
    %c0_2 = arith.constant 0 : index
    %c0_3 = arith.constant 0 : index
    %4 = vector.load %arg3[%c0_2, %c0_3] : memref<1x48xf32, #tpu.memory_space<vmem>>, vector<1x48xf32>
    %c0_4 = arith.constant 0 : index
    %c0_5 = arith.constant 0 : index
    %5 = vector.load %arg4[%c0_4, %c0_5] : memref<48x8xf32, #tpu.memory_space<vmem>>, vector<48x8xf32>
    %6 = tpu.iota {dimensions = array<i32: 0>} : vector<24x48xi32>
    %c24_i32 = arith.constant 24 : i32
    %7 = arith.muli %arg0, %c24_i32 : i32
    %8 = vector.broadcast %7 : i32 to vector<24x48xi32>
    %9 = arith.addi %6, %8 : vector<24x48xi32>
    %10 = vector.broadcast %3 : vector<1x48xi32> to vector<24x48xi32>
    %11 = arith.cmpi eq, %9, %10 : vector<24x48xi32>
    %cst = arith.constant 0.000000e+00 : f32
    %12 = vector.shape_cast %4 : vector<1x48xf32> to vector<1x48xf32>
    %13 = vector.broadcast %12 : vector<1x48xf32> to vector<24x48xf32>
    %14 = vector.broadcast %cst : f32 to vector<24x48xf32>
    %15 = arith.select %11, %13, %14 : vector<24x48xi1>, vector<24x48xf32>
    %c0_6 = arith.constant 0 : index
    %c0_7 = arith.constant 0 : index
    %16 = vector.load %arg10[%c0_6, %c0_7] : memref<24x8xf32, #tpu.memory_space<vmem>>, vector<24x8xf32>
    %cst_8 = arith.constant dense<0.000000e+00> : vector<24x8xf32>
    %17 = tpu.matmul %15, %5, %cst_8 {dimension_numbers = #tpu.dot_dimension_numbers<[1], [0], [0], [1], [0, 0, 1, 1], [], []>} : vector<24x48xf32>, vector<48x8xf32>, vector<24x8xf32> -> vector<24x8xf32>
    %18 = arith.addf %16, %17 : vector<24x8xf32>
    %c0_9 = arith.constant 0 : index
    %c0_10 = arith.constant 0 : index
    %19 = vector.load %arg10[%c0_9, %c0_10] : memref<24x8xf32, #tpu.memory_space<vmem>>, vector<24x8xf32>
    tpu.vector_store %arg10[%c0_9, %c0_10], %18 {strides = array<i32>} : memref<24x8xf32, #tpu.memory_space<vmem>>, vector<24x8xf32>,
    %c0_i32_11 = arith.constant 0 : i32
    %20 = arith.cmpi eq, %arg1, %c0_i32_11 : i32
    %21 = arith.extui %20 : i1 to i32
    %c0_i32_12 = arith.constant 0 : i32
    %22 = arith.cmpi ne, %21, %c0_i32_12 : i32
    scf.if %22 {
      %c0_13 = arith.constant 0 : index
      %c0_14 = arith.constant 0 : index
      %23 = vector.load %arg10[%c0_13, %c0_14] : memref<24x8xf32, #tpu.memory_space<vmem>>, vector<24x8xf32>
      %cst_15 = arith.constant 0.000000e+00 : f32
      %24 = vector.broadcast %cst_15 : f32 to vector<24x8xf32>
      %25 = arith.maximumf %23, %24 : vector<24x8xf32>
      %c0_16 = arith.constant 0 : index
      %c0_17 = arith.constant 0 : index
      %26 = vector.load %arg5[%c0_16, %c0_17] : memref<8x128xf32, #tpu.memory_space<vmem>>, vector<8x128xf32>
      %cst_18 = arith.constant dense<0.000000e+00> : vector<24x128xf32>
      %27 = tpu.matmul %25, %26, %cst_18 {dimension_numbers = #tpu.dot_dimension_numbers<[1], [0], [0], [1], [0, 0, 1, 1], [], []>} : vector<24x8xf32>, vector<8x128xf32>, vector<24x128xf32> -> vector<24x128xf32>
      %c0_19 = arith.constant 0 : index
      %c0_20 = arith.constant 0 : index
      %28 = vector.load %arg6[%c0_19, %c0_20] : memref<1x128xf32, #tpu.memory_space<vmem>>, vector<1x128xf32>
      %29 = vector.broadcast %28 : vector<1x128xf32> to vector<24x128xf32>
      %30 = arith.addf %27, %29 : vector<24x128xf32>
      %c0_21 = arith.constant 0 : index
      %c0_22 = arith.constant 0 : index
      %31 = vector.load %arg7[%c0_21, %c0_22] : memref<24x128xf32, #tpu.memory_space<vmem>>, vector<24x128xf32>
      %32 = arith.addf %30, %31 : vector<24x128xf32>
      %c0_23 = arith.constant 0 : index
      %c0_24 = arith.constant 0 : index
      %33 = vector.load %arg8[%c0_23, %c0_24] : memref<24x128xf32, #tpu.memory_space<vmem>>, vector<24x128xf32>
      %34 = arith.addf %32, %33 : vector<24x128xf32>
      %c0_25 = arith.constant 0 : index
      %c0_26 = arith.constant 0 : index
      %35 = vector.load %arg9[%c0_25, %c0_26] : memref<24x128xf32, #tpu.memory_space<vmem>>, vector<24x128xf32>
      tpu.vector_store %arg9[%c0_25, %c0_26], %34 {strides = array<i32>} : memref<24x128xf32, #tpu.memory_space<vmem>>, vector<24x128xf32>,
    } else {
    }
    return
  }
  func.func @transform_0(%arg0: i32, %arg1: i32) -> (i32, i32) {
    %c0_i32 = arith.constant 0 : i32
    %c0_i32_0 = arith.constant 0 : i32
    return %c0_i32, %arg1 : i32, i32
  }
  func.func @transform_1(%arg0: i32, %arg1: i32) -> (i32, i32) {
    %c0_i32 = arith.constant 0 : i32
    %c0_i32_0 = arith.constant 0 : i32
    return %c0_i32, %arg1 : i32, i32
  }
  func.func @transform_2(%arg0: i32, %arg1: i32) -> (i32, i32) {
    %c0_i32 = arith.constant 0 : i32
    %c0_i32_0 = arith.constant 0 : i32
    return %arg1, %c0_i32 : i32, i32
  }
  func.func @transform_3(%arg0: i32, %arg1: i32) -> (i32, i32) {
    %c0_i32 = arith.constant 0 : i32
    %c0_i32_0 = arith.constant 0 : i32
    %c0_i32_1 = arith.constant 0 : i32
    return %c0_i32, %c0_i32_0 : i32, i32
  }
  func.func @transform_4(%arg0: i32, %arg1: i32) -> (i32, i32) {
    %c0_i32 = arith.constant 0 : i32
    %c0_i32_0 = arith.constant 0 : i32
    %c0_i32_1 = arith.constant 0 : i32
    return %c0_i32, %c0_i32_0 : i32, i32
  }
  func.func @transform_5(%arg0: i32, %arg1: i32) -> (i32, i32) {
    %c0_i32 = arith.constant 0 : i32
    %c0_i32_0 = arith.constant 0 : i32
    return %arg0, %c0_i32 : i32, i32
  }
  func.func @transform_6(%arg0: i32, %arg1: i32) -> (i32, i32) {
    %c0_i32 = arith.constant 0 : i32
    %c0_i32_0 = arith.constant 0 : i32
    return %arg0, %c0_i32 : i32, i32
  }
  func.func @transform_7(%arg0: i32, %arg1: i32) -> (i32, i32) {
    %c0_i32 = arith.constant 0 : i32
    %c0_i32_0 = arith.constant 0 : i32
    return %arg0, %c0_i32 : i32, i32
  }
}

module attributes {stable_mosaic.version = 11 : i64} {
  func.func @_segment_sum_kernel(%arg0: i32, %arg1: i32, %arg2: memref<1x24xi32, #tpu.memory_space<vmem>>, %arg3: memref<1x24xf32, #tpu.memory_space<vmem>>, %arg4: memref<24x128xf32, #tpu.memory_space<vmem>>, %arg5: memref<8x128xf32, #tpu.memory_space<vmem>>, %arg6: memref<8x128xf32, #tpu.memory_space<vmem>>) attributes {dimension_semantics = [#tpu.dimension_semantics<parallel>, #tpu.dimension_semantics<arbitrary>], iteration_bounds = array<i64: 1, 1>, scalar_prefetch = 0 : i64, scratch_operands = 1 : i64, tpu.core_type = #tpu.core_type<tc>, window_params = [{transform_indices = @transform_0, window_bounds = array<i64: 1, 24>}, {transform_indices = @transform_1, window_bounds = array<i64: 1, 24>}, {transform_indices = @transform_2, window_bounds = array<i64: 24, 128>}, {transform_indices = @transform_3, window_bounds = array<i64: 8, 128>}]} {
    %c0_i32 = arith.constant 0 : i32
    %0 = arith.cmpi eq, %arg1, %c0_i32 : i32
    %1 = arith.extui %0 : i1 to i32
    %c0_i32_0 = arith.constant 0 : i32
    %2 = arith.cmpi ne, %1, %c0_i32_0 : i32
    scf.if %2 {
      %cst_13 = arith.constant 0.000000e+00 : f32
      %23 = vector.broadcast %cst_13 : f32 to vector<8x128xf32>
      %c0_14 = arith.constant 0 : index
      %c0_15 = arith.constant 0 : index
      %24 = vector.load %arg6[%c0_14, %c0_15] : memref<8x128xf32, #tpu.memory_space<vmem>>, vector<8x128xf32>
      tpu.vector_store %arg6[%c0_14, %c0_15], %23 {strides = array<i32>} : memref<8x128xf32, #tpu.memory_space<vmem>>, vector<8x128xf32>,
    } else {
    }
    %c0 = arith.constant 0 : index
    %c0_1 = arith.constant 0 : index
    %3 = vector.load %arg2[%c0, %c0_1] : memref<1x24xi32, #tpu.memory_space<vmem>>, vector<1x24xi32>
    %c0_2 = arith.constant 0 : index
    %c0_3 = arith.constant 0 : index
    %4 = vector.load %arg3[%c0_2, %c0_3] : memref<1x24xf32, #tpu.memory_space<vmem>>, vector<1x24xf32>
    %c0_4 = arith.constant 0 : index
    %c0_5 = arith.constant 0 : index
    %5 = vector.load %arg4[%c0_4, %c0_5] : memref<24x128xf32, #tpu.memory_space<vmem>>, vector<24x128xf32>
    %6 = tpu.iota {dimensions = array<i32: 0>} : vector<8x24xi32>
    %c8_i32 = arith.constant 8 : i32
    %7 = arith.muli %arg0, %c8_i32 : i32
    %8 = vector.broadcast %7 : i32 to vector<8x24xi32>
    %9 = arith.addi %6, %8 : vector<8x24xi32>
    %10 = vector.broadcast %3 : vector<1x24xi32> to vector<8x24xi32>
    %11 = arith.cmpi eq, %9, %10 : vector<8x24xi32>
    %cst = arith.constant 0.000000e+00 : f32
    %12 = vector.shape_cast %4 : vector<1x24xf32> to vector<1x24xf32>
    %13 = vector.broadcast %12 : vector<1x24xf32> to vector<8x24xf32>
    %14 = vector.broadcast %cst : f32 to vector<8x24xf32>
    %15 = arith.select %11, %13, %14 : vector<8x24xi1>, vector<8x24xf32>
    %c0_6 = arith.constant 0 : index
    %c0_7 = arith.constant 0 : index
    %16 = vector.load %arg6[%c0_6, %c0_7] : memref<8x128xf32, #tpu.memory_space<vmem>>, vector<8x128xf32>
    %cst_8 = arith.constant dense<0.000000e+00> : vector<8x128xf32>
    %17 = tpu.matmul %15, %5, %cst_8 {dimension_numbers = #tpu.dot_dimension_numbers<[1], [0], [0], [1], [0, 0, 1, 1], [], []>} : vector<8x24xf32>, vector<24x128xf32>, vector<8x128xf32> -> vector<8x128xf32>
    %18 = arith.addf %16, %17 : vector<8x128xf32>
    %c0_9 = arith.constant 0 : index
    %c0_10 = arith.constant 0 : index
    %19 = vector.load %arg6[%c0_9, %c0_10] : memref<8x128xf32, #tpu.memory_space<vmem>>, vector<8x128xf32>
    tpu.vector_store %arg6[%c0_9, %c0_10], %18 {strides = array<i32>} : memref<8x128xf32, #tpu.memory_space<vmem>>, vector<8x128xf32>,
    %c0_i32_11 = arith.constant 0 : i32
    %20 = arith.cmpi eq, %arg1, %c0_i32_11 : i32
    %21 = arith.extui %20 : i1 to i32
    %c0_i32_12 = arith.constant 0 : i32
    %22 = arith.cmpi ne, %21, %c0_i32_12 : i32
    scf.if %22 {
      %c0_13 = arith.constant 0 : index
      %c0_14 = arith.constant 0 : index
      %23 = vector.load %arg6[%c0_13, %c0_14] : memref<8x128xf32, #tpu.memory_space<vmem>>, vector<8x128xf32>
      %c0_15 = arith.constant 0 : index
      %c0_16 = arith.constant 0 : index
      %24 = vector.load %arg5[%c0_15, %c0_16] : memref<8x128xf32, #tpu.memory_space<vmem>>, vector<8x128xf32>
      tpu.vector_store %arg5[%c0_15, %c0_16], %23 {strides = array<i32>} : memref<8x128xf32, #tpu.memory_space<vmem>>, vector<8x128xf32>,
    } else {
    }
    return
  }
  func.func @transform_0(%arg0: i32, %arg1: i32) -> (i32, i32) {
    %c0_i32 = arith.constant 0 : i32
    %c0_i32_0 = arith.constant 0 : i32
    return %c0_i32, %arg1 : i32, i32
  }
  func.func @transform_1(%arg0: i32, %arg1: i32) -> (i32, i32) {
    %c0_i32 = arith.constant 0 : i32
    %c0_i32_0 = arith.constant 0 : i32
    return %c0_i32, %arg1 : i32, i32
  }
  func.func @transform_2(%arg0: i32, %arg1: i32) -> (i32, i32) {
    %c0_i32 = arith.constant 0 : i32
    %c0_i32_0 = arith.constant 0 : i32
    return %arg1, %c0_i32 : i32, i32
  }
  func.func @transform_3(%arg0: i32, %arg1: i32) -> (i32, i32) {
    %c0_i32 = arith.constant 0 : i32
    %c0_i32_0 = arith.constant 0 : i32
    return %arg0, %c0_i32 : i32, i32
  }
}

</mosaic_0001>

<bundles_post_ra>
// kernel: sub.23
= control target key start
LH: loop header
LB: loop body
LE: loop exit
PB: predicated region body
PF: predicated region fallthrough
CT: control target
= control target key end

     0   :  { %s144_s0 = inlined_call_operand.vmem [shape: f32[48,3], index: 0, kind: input, shape index: {}]   ;;  %s145_s1 = inlined_call_operand.vmem [shape: f32[48,3], index: 1, kind: input, shape index: {}]   ;;  %s146_s2 = inlined_call_operand.vmem [shape: f32[48,3], index: 2, kind: output, shape index: {}]  }
   0x1   :  { %v3_v0 = vld [vmem:[%s144_s0] sm:$0xff]  ;;  %v60_v2 = vld [vmem:[%s144_s0 + $0x8] sm:$0xff]  ;;  %v63_v5 = vld [vmem:[%s144_s0 + $0x10] sm:$0xff] }
   0x2   :  { %v4_v1 = vld [vmem:[%s145_s1] sm:$0xff]  ;;  %v61_v4 = vld [vmem:[%s145_s1 + $0x8] sm:$0xff]  ;;  %v64_v6 = vld [vmem:[%s145_s1 + $0x10] sm:$0xff] }
   0x3   :  { %v7_v3 = vsub.f32 %v3_v0, %v4_v1  ;;  %v16_v7 = vsub.f32 %v60_v2, %v61_v4  ;;  %v26_v8 = vsub.f32 %v63_v5, %v64_v6  ;;  %v66_v9 = vld [vmem:[%s144_s0 + $0x18] sm:$0xff]  ;;  %v69_v11 = vld [vmem:[%s144_s0 + $0x20] sm:$0xff]  ;;  %v72_v14 = vld [vmem:[%s144_s0 + $0x28] sm:$0xff] }
   0x4   :  { %v67_v10 = vld [vmem:[%s145_s1 + $0x18] sm:$0xff]  ;;  %v70_v13 = vld [vmem:[%s145_s1 + $0x20] sm:$0xff]  ;;  %v73_v15 = vld [vmem:[%s145_s1 + $0x28] sm:$0xff] }
   0x5   :  { %9 = vst [vmem:[%s146_s2] sm:$0xff] %v7_v3  ;;  %v36_v12 = vsub.f32 %v66_v9, %v67_v10  ;;  %62 = vst [vmem:[%s146_s2 + $0x8] sm:$0xff] %v16_v7  ;;  %v46_v16 = vsub.f32 %v69_v11, %v70_v13  ;;  %v56_v17 = vsub.f32 %v72_v14, %v73_v15 }
   0x6   :  { %65 = vst [vmem:[%s146_s2 + $0x10] sm:$0xff] %v26_v8 }
   0x7   :  { %68 = vst [vmem:[%s146_s2 + $0x18] sm:$0xff] %v36_v12  ;;  %71 = vst [vmem:[%s146_s2 + $0x20] sm:$0xff] %v46_v16 }
   0x8   :  { %74 = vst [vmem:[%s146_s2 + $0x28] sm:$0xff] %v56_v17 }

// kernel: forward.8
= control target key start
LH: loop header
LB: loop body
LE: loop exit
PB: predicated region body
PF: predicated region fallthrough
CT: control target
= control target key end

     0   :  { %v151_v0 = vmov 0.0   ;;  %vm26_vm0 = vcmask 130048   ;;  %vm152_vm1 = vmmov 0   ;;  %s200_s1 = inlined_call_operand.vmem [shape: f32[16,128], index: 1, kind: input, shape index: {}]   ;;  %s201_s0 = inlined_call_operand.vmem [shape: f32[24,16], index: 0, kind: input, shape index: {}]   ;;  %s202_s2 = inlined_call_operand.vmem [shape: f32[1,128], index: 2, kind: input, shape index: {}]   ;;  %s203_s3 = inlined_call_operand.vmem [shape: f32[24,128], index: 3, kind: output, shape index: {}]  }
   0x1   :  { %145 = vmatprep.subr.mxu1 %v151_v0  ;;  %v18_v1 = vld [vmem:[%s200_s1 + $0x8] sm:$0xff]  ;;  %132 = vmatprep.subr.mxu0 %v151_v0  ;;  %v17_v2 = vld [vmem:[%s200_s1] sm:$0xff]  ;;  %v16_v5 = vld [vmem:[%s201_s0 + $0x10] sm:$0xff] }
   0x2   :  { %147 = vmatpush3.msra.mxu1 %v18_v1  ;;  %133 = vmatpush3.msra.mxu0 %v18_v1  ;;  %v15_v3 = vld [vmem:[%s201_s0 + $0x8] sm:$0xff]  ;;  %v14_v4 = vld [vmem:[%s201_s0] sm:$0xff] }
   0x3   :  { %146 = vmatprep.subr.mxu1 %v151_v0  ;;  %139 = vmatprep.mubr.msk.f32.mxu1 %vm152_vm1, %v151_v0  ;;  %v123_v6 = vld [vmem:[%s202_s2] ss:$0 sm:$0xff] }
   0x4   :  { %148 = vmatpush3.msra.mxu1 %v17_v2  ;;  %134 = vmatprep.subr.mxu0 %v151_v0 }
   0x5   :  { %140 = vmatmul.mubr.msk.f32.vlgmr.msra.gmra.mxu1 %vm26_vm0, %v15_v3  ;;  %135 = vmatpush3.msra.mxu0 %v17_v2 }
   0x6   :  { %136 = vmatprep.mubr.msk.f32.mxu0 %vm152_vm1, %v151_v0  ;;  %142 = vmatprep.mubr.msk.f32.mxu1 %vm152_vm1, %v151_v0 }
   0x7   :  { %137 = vmatmul.mubr.msk.f32.vlgmr.msra.gmra.mxu0 %vm26_vm0, %v14_v4 }
   0x9   :  { %143 = vmatmul.mubr.msk.f32.gmra.mxu1 %vm26_vm0, %v16_v5 }
  0xc5   :  { %v107_v7 = vpop.f32.mrf.mxu1 }
  0xc6   :  { %v108_v8 = vadd.f32 %v123_v6, %v107_v7 }
  0xc7   :  { %v102_v9 = vpop.f32.mrf.mxu0  ;;  %v141_v10 = vpop.f32.mrf.mxu1 }
  0xc8   :  { %117 = vst [vmem:[%s203_s3 + $0x8] sm:$0xff] %v108_v8  ;;  %v103_v11 = vadd.f32 %v123_v6, %v102_v9 }
  0xc9   :  { %v138_v12 = vpop.f32.mrf.mxu0  ;;  %v112_v13 = vpop.f32.mrf.mxu1 }
  0xca   :  { %116 = vst [vmem:[%s203_s3] sm:$0xff] %v103_v11  ;;  %v113_v14 = vadd.f32 %v123_v6, %v112_v13 }
  0xcb   :  { %v144_v15 = vpop.f32.mrf.mxu1 }
  0xcc   :  { %118 = vst [vmem:[%s203_s3 + $0x10] sm:$0xff] %v113_v14 }

// kernel: forward.10
= control target key start
LH: loop header
LB: loop body
LE: loop exit
PB: predicated region body
PF: predicated region fallthrough
CT: control target
= control target key end

     0   :  { %vm211_vm0 = vcmask 1045504   ;;  %vm192_vm1 = vcmask 113664   ;;  %vm327_vm2 = vcmask 261120   ;;  %vm548_vm3 = vcmask 64512   ;;  %s1302_s2 = inlined_call_operand.vmem [shape: f32[128,8], index: 2, kind: input, shape index: {}]   ;;  %s1303_s4 = inlined_call_operand.vmem [shape: f32[14,32], index: 4, kind: input, shape index: {}]   ;;  %s1304_s1 = inlined_call_operand.vmem [shape: f32[48,14], index: 1, kind: input, shape index: {}]   ;;  %s1305_s0 = inlined_call_operand.vmem [shape: f32[48,128], index: 0, kind: input, shape index: {}]   ;;  %s1306_s6 = inlined_call_operand.vmem [shape: f32[32,8], index: 6, kind: input, shape index: {}]   ;;  %s1307_s8 = inlined_call_operand.vmem [shape: f32[32,64], index: 8, kind: input, shape index: {}]   ;;  %s1308_s5 = inlined_call_operand.vmem [shape: f32[1,32], index: 5, kind: input, shape index: {}]   ;;  %s1309_s10 = inlined_call_operand.vmem [shape: f32[8,64], index: 10, kind: input, shape index: {}]   ;;  %s1310_s3 = inlined_call_operand.vmem [shape: f32[1,8], index: 3, kind: input, shape index: {}]   ;;  %s1311_s11 = inlined_call_operand.vmem [shape: f32[64,8], index: 11, kind: input, shape index: {}]   ;;  %s1312_s9 = inlined_call_operand.vmem [shape: f32[1,64], index: 9, kind: input, shape index: {}]   ;;  %s1313_s7 = inlined_call_operand.vmem [shape: f32[1,8], index: 7, kind: input, shape index: {}]   ;;  %s1314_s12 = inlined_call_operand.vmem [shape: f32[48,8], index: 12, kind: output, shape index: {}]  }
   0x1   :  { %v68_v0 = vld [vmem:[%s1302_s2 + $0x78] sm:$0xff]  ;;  %v184_v1 = vld [vmem:[%s1303_s4 + $0x8] sm:$0x3f]  ;;  %v67_v2 = vld [vmem:[%s1302_s2 + $0x70] sm:$0xff]  ;;  %vm676_vm4 = vcmask 523264  }
   0x2   :  { %906 = vmatprep.subr.mxu0 %v68_v0  ;;  %947 = vmatprep.subr.msk.mxu1 %vm211_vm0, %v184_v1  ;;  %v183_v3 = vld [vmem:[%s1303_s4] sm:$0xff]  ;;  %v66_v5 = vld [vmem:[%s1302_s2 + $0x68] sm:$0xff]  ;;  %v179_v8 = vld [vmem:[%s1304_s1 + $0x10] sm:$0xff] }
   0x3   :  { %907 = vmatpush3.msra.mxu0 %v68_v0  ;;  %948 = vmatpush3.msk.msra.mxu1 %vm211_vm0, %v184_v1  ;;  %v177_v4 = vld [vmem:[%s1304_s1] sm:$0xff]  ;;  %v178_v6 = vld [vmem:[%s1304_s1 + $0x8] sm:$0xff]  ;;  %v64_v9 = vld [vmem:[%s1302_s2 + $0x58] sm:$0xff] }
   0x4   :  { %908 = vmatprep.subr.mxu0 %v67_v2  ;;  %949 = vmatprep.subr.mxu1 %v183_v3  ;;  %v65_v7 = vld [vmem:[%s1302_s2 + $0x60] sm:$0xff]  ;;  %v180_v10 = vld [vmem:[%s1304_s1 + $0x18] sm:$0xff]  ;;  %v63_v11 = vld [vmem:[%s1302_s2 + $0x50] sm:$0xff] }
   0x5   :  { %909 = vmatpush3.msra.mxu0 %v67_v2  ;;  %950 = vmatpush3.msra.mxu1 %v183_v3  ;;  %v181_v12 = vld [vmem:[%s1304_s1 + $0x20] sm:$0xff]  ;;  %v62_v15 = vld [vmem:[%s1302_s2 + $0x48] sm:$0xff]  ;;  %v319_v16 = vld [vmem:[%s1306_s6 + $0x18] sm:$0xff] }
   0x6   :  { %951 = vmatprep.mubr.msk.f32.mxu1 %vm192_vm1, %v177_v4  ;;  %910 = vmatprep.subr.mxu0 %v66_v5  ;;  %v41_v13 = vld [vmem:[%s1305_s0] sm:$0xff]  ;;  %v182_v17 = vld [vmem:[%s1304_s1 + $0x28] sm:$0xff]  ;;  %v60_v19 = vld [vmem:[%s1302_s2 + $0x38] sm:$0xff] }
   0x7   :  { %952 = vmatmul.mubr.msk.f32.vlgmr.msra.gmra.mxu1 %vm192_vm1, %v178_v6  ;;  %911 = vmatpush3.msra.mxu0 %v66_v5  ;;  %v47_v14 = vmax.f32 %v41_v13, 0.0  ;;  %v61_v18 = vld [vmem:[%s1302_s2 + $0x40] sm:$0xff]  ;;  %v59_v20 = vld [vmem:[%s1302_s2 + $0x30] sm:$0xff]  ;;  %v58_v21 = vld [vmem:[%s1302_s2 + $0x28] sm:$0xff] }
   0x8   :  { %912 = vmatprep.subr.mxu0 %v65_v7  ;;  %954 = vmatprep.mubr.msk.f32.mxu1 %vm192_vm1, %v179_v8  ;;  %v57_v22 = vld [vmem:[%s1302_s2 + $0x20] sm:$0xff]  ;;  %v56_v23 = vld [vmem:[%s1302_s2 + $0x18] sm:$0xff]  ;;  %v55_v24 = vld [vmem:[%s1302_s2 + $0x10] sm:$0xff] }
   0x9   :  { %913 = vmatpush3.msra.mxu0 %v65_v7  ;;  %938 = vmatprep.mubr.f32.mxu0 %v47_v14  ;;  %v54_v25 = vld [vmem:[%s1302_s2 + $0x8] sm:$0xff]  ;;  %v43_v27 = vld [vmem:[%s1305_s0 + $0x10] sm:$0xff]  ;;  %v53_v28 = vld [vmem:[%s1302_s2] sm:$0xff] }
   0xa   :  { %914 = vmatprep.subr.mxu0 %v64_v9  ;;  %960 = vmatprep.subr.mxu1 %v319_v16  ;;  %v42_v26 = vld [vmem:[%s1305_s0 + $0x8] sm:$0xff]  ;;  %v49_v30 = vmax.f32 %v43_v27, 0.0  ;;  %v44_v31 = vld [vmem:[%s1305_s0 + $0x18] sm:$0xff]  ;;  %v45_v32 = vld [vmem:[%s1305_s0 + $0x20] sm:$0xff] }
   0xb   :  { %955 = vmatmul.mubr.msk.f32.gmra.mxu1 %vm192_vm1, %v180_v10  ;;  %915 = vmatpush3.msra.mxu0 %v64_v9  ;;  %v48_v29 = vmax.f32 %v42_v26, 0.0  ;;  %v50_v33 = vmax.f32 %v44_v31, 0.0  ;;  %v51_v34 = vmax.f32 %v45_v32, 0.0  ;;  %v46_v35 = vld [vmem:[%s1305_s0 + $0x28] sm:$0xff]  ;;  %v318_v37 = vld [vmem:[%s1306_s6 + $0x10] sm:$0xff]  ;;  %v316_v39 = vld [vmem:[%s1306_s6] sm:$0xff] }
   0xc   :  { %916 = vmatprep.subr.mxu0 %v63_v11  ;;  %957 = vmatprep.mubr.msk.f32.mxu1 %vm192_vm1, %v181_v12  ;;  %v52_v36 = vmax.f32 %v46_v35, 0.0  ;;  %v317_v38 = vld [vmem:[%s1306_s6 + $0x8] sm:$0xff]  ;;  %v444_v40 = vld [vmem:[%s1307_s8 + $0x18] sm:$0xff]  ;;  %v801_v41 = vld [vmem:[%s1308_s5] ss:$0 sm:$0xff] }
   0xd   :  { %917 = vmatpush3.msra.mxu0 %v63_v11  ;;  %961 = vmatpush3.msra.mxu1 %v319_v16  ;;  %v443_v52 = vld [vmem:[%s1307_s8 + $0x10] sm:$0xff]  ;;  %v442_v57 = vld [vmem:[%s1307_s8 + $0x8] sm:$0xff]  ;;  %v441_v60 = vld [vmem:[%s1307_s8] sm:$0xff] }
   0xe   :  { %918 = vmatprep.subr.mxu0 %v62_v15  ;;  %962 = vmatprep.subr.mxu1 %v318_v37  ;;  %v547_v63 = vld [vmem:[%s1309_s10] sm:$0xff] }
   0xf   :  { %958 = vmatmul.mubr.msk.f32.gmra.mxu1 %vm192_vm1, %v182_v17  ;;  %919 = vmatpush3.msra.mxu0 %v62_v15  ;;  %v800_v0 = vld [vmem:[%s1310_s3] ss:$0 sm:$0xff] }
  0x10   :  { %920 = vmatprep.subr.mxu0 %v61_v18  ;;  %963 = vmatpush3.msra.mxu1 %v318_v37  ;;  %v668_v26 = vld [vmem:[%s1311_s11] sm:$0xff] }
  0x11   :  { %921 = vmatpush3.msra.mxu0 %v61_v18  ;;  %964 = vmatprep.subr.mxu1 %v317_v38 }
  0x12   :  { %922 = vmatprep.subr.mxu0 %v60_v19  ;;  %965 = vmatpush3.msra.mxu1 %v317_v38 }
  0x13   :  { %923 = vmatpush3.msra.mxu0 %v60_v19  ;;  %966 = vmatprep.subr.mxu1 %v316_v39  ;;  %v675_v19 = vld [vmem:[%s1311_s11 + $0x38] sm:$0xff] }
  0x14   :  { %924 = vmatprep.subr.mxu0 %v59_v20  ;;  %967 = vmatpush3.msra.mxu1 %v316_v39  ;;  %v816_v39 = vld [vmem:[%s1312_s9] ss:$0 sm:$0xff] }
  0x15   :  { %925 = vmatpush3.msra.mxu0 %v59_v20  ;;  %977 = vmatprep.subr.mxu1 %v444_v40  ;;  %v674_v20 = vld [vmem:[%s1311_s11 + $0x30] sm:$0xff] }
  0x16   :  { %926 = vmatprep.subr.mxu0 %v58_v21 }
  0x17   :  { %927 = vmatpush3.msra.mxu0 %v58_v21  ;;  %v673_v21 = vld [vmem:[%s1311_s11 + $0x28] sm:$0xff] }
  0x18   :  { %928 = vmatprep.subr.mxu0 %v57_v22 }
  0x19   :  { %929 = vmatpush3.msra.mxu0 %v57_v22  ;;  %v672_v22 = vld [vmem:[%s1311_s11 + $0x20] sm:$0xff] }
  0x1a   :  { %930 = vmatprep.subr.mxu0 %v56_v23 }
  0x1b   :  { %931 = vmatpush3.msra.mxu0 %v56_v23  ;;  %v671_v23 = vld [vmem:[%s1311_s11 + $0x18] sm:$0xff] }
  0x1c   :  { %932 = vmatprep.subr.mxu0 %v55_v24 }
  0x1d   :  { %933 = vmatpush3.msra.mxu0 %v55_v24  ;;  %v670_v24 = vld [vmem:[%s1311_s11 + $0x10] sm:$0xff] }
  0x1e   :  { %934 = vmatprep.subr.mxu0 %v54_v25 }
  0x1f   :  { %935 = vmatpush3.msra.mxu0 %v54_v25  ;;  %v669_v25 = vld [vmem:[%s1311_s11 + $0x8] sm:$0xff] }
  0x20   :  { %936 = vmatprep.subr.mxu0 %v53_v28 }
  0x21   :  { %937 = vmatpush3.msra.mxu0 %v53_v28 }
  0x22   :  { %939 = vmatmul.mubr.f32.vlgmr.msra.gmra.mxu0 %v48_v29  ;;  %1005 = vmatprep.subr.mxu0 %v675_v19 }
  0x23   :  { %941 = vmatprep.mubr.f32.mxu0 %v49_v30  ;;  %1006 = vmatpush3.msra.mxu0 %v675_v19 }
  0x24   :  { %1007 = vmatprep.subr.mxu0 %v674_v20 }
  0x25   :  { %1008 = vmatpush3.msra.mxu0 %v674_v20 }
  0x26   :  { %942 = vmatmul.mubr.f32.gmra.mxu0 %v50_v33  ;;  %1009 = vmatprep.subr.mxu0 %v673_v21 }
  0x27   :  { %944 = vmatprep.mubr.f32.mxu0 %v51_v34  ;;  %1010 = vmatpush3.msra.mxu0 %v673_v21 }
  0x28   :  { %1011 = vmatprep.subr.mxu0 %v672_v22 }
  0x29   :  { %1012 = vmatpush3.msra.mxu0 %v672_v22 }
  0x2a   :  { %945 = vmatmul.mubr.f32.gmra.mxu0 %v52_v36  ;;  %1013 = vmatprep.subr.mxu0 %v671_v23 }
  0x2b   :  { %1014 = vmatpush3.msra.mxu0 %v671_v23 }
  0x2c   :  { %1015 = vmatprep.subr.mxu0 %v670_v24 }
  0x2d   :  { %1016 = vmatpush3.msra.mxu0 %v670_v24 }
  0x2e   :  { %1017 = vmatprep.subr.mxu0 %v669_v25 }
  0x2f   :  { %1018 = vmatpush3.msra.mxu0 %v669_v25 }
  0x30   :  { %1019 = vmatprep.subr.mxu0 %v668_v26 }
  0x31   :  { %1020 = vmatpush3.msra.mxu0 %v668_v26 }
  0xc7   :  { %v953_v42 = vpop.f32.mrf.mxu1 }
  0xc8   :  { %v287_v43 = vadd.f32 %v953_v42, %v801_v41 }
  0xc9   :  { %v281_v44 = vpop.f32.mrf.mxu1 }
  0xca   :  { %v282_v45 = vadd.f32 %v801_v41, %v281_v44  ;;  %v311_v46 = vmax.f32 %v287_v43, 0.0 }
  0xcb   :  { %v956_v47 = vpop.f32.mrf.mxu1 }
  0xcc   :  { %v310_v48 = vmax.f32 %v282_v45, 0.0  ;;  %v297_v49 = vadd.f32 %v956_v47, %v801_v41 }
  0xcd   :  { %v291_v50 = vpop.f32.mrf.mxu1 }
  0xce   :  { %v292_v51 = vadd.f32 %v801_v41, %v291_v50  ;;  %968 = vmatprep.mubr.msk.f32.mxu1 %vm327_vm2, %v310_v48  ;;  %v313_v53 = vmax.f32 %v297_v49, 0.0 }
  0xcf   :  { %v959_v54 = vpop.f32.mrf.mxu1  ;;  %969 = vmatmul.mubr.msk.f32.vlgmr.msra.gmra.mxu1 %vm327_vm2, %v311_v46 }
  0xd0   :  { %v312_v55 = vmax.f32 %v292_v51, 0.0  ;;  %v307_v56 = vadd.f32 %v959_v54, %v801_v41  ;;  %978 = vmatpush3.msra.mxu1 %v444_v40 }
  0xd1   :  { %v301_v58 = vpop.f32.mrf.mxu1  ;;  %979 = vmatprep.subr.mxu1 %v443_v52 }
  0xd2   :  { %v302_v59 = vadd.f32 %v801_v41, %v301_v58  ;;  %971 = vmatprep.mubr.msk.f32.mxu1 %vm327_vm2, %v312_v55  ;;  %980 = vmatpush3.msra.mxu1 %v443_v52  ;;  %v315_v61 = vmax.f32 %v307_v56, 0.0  ;;  %v809_v58 = vld [vmem:[%s1313_s7] ss:$0 sm:$0xff] }
  0xd3   :  { %972 = vmatmul.mubr.msk.f32.gmra.mxu1 %vm327_vm2, %v313_v53  ;;  %981 = vmatprep.subr.mxu1 %v442_v57 }
  0xd4   :  { %v314_v62 = vmax.f32 %v302_v59, 0.0  ;;  %982 = vmatpush3.msra.mxu1 %v442_v57 }
  0xd5   :  { %983 = vmatprep.subr.mxu1 %v441_v60 }
  0xd6   :  { %974 = vmatprep.mubr.msk.f32.mxu1 %vm327_vm2, %v314_v62  ;;  %984 = vmatpush3.msra.mxu1 %v441_v60 }
  0xd7   :  { %975 = vmatmul.mubr.msk.f32.gmra.mxu1 %vm327_vm2, %v315_v61  ;;  %994 = vmatprep.subr.mxu1 %v547_v63 }
  0xd8   :  { %985 = vmatprep.mubr.msk.f32.mxu1 %vm327_vm2, %v310_v48 }
  0xdb   :  { %986 = vmatmul.mubr.msk.f32.vlgmr.msra.gmra.mxu1 %vm327_vm2, %v311_v46 }
  0xdc   :  { %988 = vmatprep.mubr.msk.f32.mxu1 %vm327_vm2, %v312_v55  ;;  %995 = vmatpush3.msra.mxu1 %v547_v63 }
  0xdf   :  { %989 = vmatmul.mubr.msk.f32.gmra.mxu1 %vm327_vm2, %v313_v53 }
  0xe0   :  { %991 = vmatprep.mubr.msk.f32.mxu1 %vm327_vm2, %v314_v62 }
  0xe2   :  { %v940_v1 = vpop.f32.mrf.mxu0 }
  0xe3   :  { %992 = vmatmul.mubr.msk.f32.gmra.mxu1 %vm327_vm2, %v315_v61  ;;  %v148_v2 = vadd.f32 %v940_v1, %v800_v0 }
  0xe4   :  { %v142_v3 = vpop.f32.mrf.mxu0 }
  0xe5   :  { %v143_v4 = vadd.f32 %v800_v0, %v142_v3  ;;  %v172_v7 = vmax.f32 %v148_v2, 0.0 }
  0xe6   :  { %v943_v5 = vpop.f32.mrf.mxu0 }
  0xe7   :  { %v171_v6 = vmax.f32 %v143_v4, 0.0  ;;  %v158_v8 = vadd.f32 %v943_v5, %v800_v0 }
  0xe8   :  { %v152_v9 = vpop.f32.mrf.mxu0 }
  0xe9   :  { %v153_v10 = vadd.f32 %v800_v0, %v152_v9  ;;  %996 = vmatprep.mubr.msk.f32.mxu1 %vm548_vm3, %v171_v6  ;;  %v174_v13 = vmax.f32 %v158_v8, 0.0 }
  0xea   :  { %v946_v11 = vpop.f32.mrf.mxu0  ;;  %997 = vmatmul.mubr.msk.f32.vlgmr.msra.gmra.mxu1 %vm548_vm3, %v172_v7 }
  0xeb   :  { %v173_v12 = vmax.f32 %v153_v10, 0.0  ;;  %v168_v14 = vadd.f32 %v946_v11, %v800_v0 }
  0xec   :  { %v162_v15 = vpop.f32.mrf.mxu0 }
  0xed   :  { %v163_v16 = vadd.f32 %v800_v0, %v162_v15  ;;  %999 = vmatprep.mubr.msk.f32.mxu1 %vm548_vm3, %v173_v12  ;;  %v176_v18 = vmax.f32 %v168_v14, 0.0 }
  0xee   :  { %1000 = vmatmul.mubr.msk.f32.gmra.mxu1 %vm548_vm3, %v174_v13 }
  0xef   :  { %v175_v17 = vmax.f32 %v163_v16, 0.0 }
  0xf1   :  { %1002 = vmatprep.mubr.msk.f32.mxu1 %vm548_vm3, %v175_v17 }
  0xf2   :  { %1003 = vmatmul.mubr.msk.f32.gmra.mxu1 %vm548_vm3, %v176_v18 }
 0x18f   :  { %v970_v27 = vpop.f32.mrf.mxu1 }
 0x190   :  { %v418_v59 = vadd.f32 %v970_v27, %v809_v58 }
 0x191   :  { %v412_v28 = vpop.f32.mrf.mxu1 }
 0x192   :  { %v413_v61 = vadd.f32 %v809_v58, %v412_v28 }
 0x193   :  { %v973_v29 = vpop.f32.mrf.mxu1 }
 0x194   :  { %v428_v0 = vadd.f32 %v973_v29, %v809_v58 }
 0x195   :  { %v422_v30 = vpop.f32.mrf.mxu1 }
 0x196   :  { %v423_v3 = vadd.f32 %v809_v58, %v422_v30 }
 0x197   :  { %v976_v31 = vpop.f32.mrf.mxu1 }
 0x198   :  { %v438_v6 = vadd.f32 %v976_v31, %v809_v58 }
 0x199   :  { %v432_v32 = vpop.f32.mrf.mxu1 }
 0x19a   :  { %v433_v9 = vadd.f32 %v809_v58, %v432_v32 }
 0x19b   :  { %v987_v33 = vpop.f32.mrf.mxu1 }
 0x19c   :  { %v524_v42 = vadd.f32 %v987_v33, %v816_v39 }
 0x19d   :  { %v518_v34 = vpop.f32.mrf.mxu1 }
 0x19e   :  { %v519_v41 = vadd.f32 %v816_v39, %v518_v34 }
 0x19f   :  { %v990_v35 = vpop.f32.mrf.mxu1 }
 0x1a0   :  { %v534_v48 = vadd.f32 %v990_v35, %v816_v39 }
 0x1a1   :  { %v528_v36 = vpop.f32.mrf.mxu1 }
 0x1a2   :  { %v529_v47 = vadd.f32 %v816_v39, %v528_v36 }
 0x1a3   :  { %v993_v37 = vpop.f32.mrf.mxu1 }
 0x1a4   :  { %v544_v54 = vadd.f32 %v993_v37, %v816_v39 }
 0x1a5   :  { %v538_v38 = vpop.f32.mrf.mxu1 }
 0x1a6   :  { %v539_v53 = vadd.f32 %v816_v39, %v538_v38 }
 0x1aa   :  { %v998_v40 = vpop.f32.mrf.mxu1 }
 0x1ab   :  { %v663_v45 = vmul.f32 %v998_v40, %v524_v42 }
 0x1ac   :  { %v633_v43 = vpop.f32.mrf.mxu1 }
 0x1ad   :  { %v662_v44 = vmul.f32 %v633_v43, %v519_v41 }
 0x1ae   :  { %v1001_v46 = vpop.f32.mrf.mxu1 }
 0x1af   :  { %1021 = vmatprep.mubr.msk.f32.mxu0 %vm676_vm4, %v662_v44  ;;  %v665_v51 = vmul.f32 %v1001_v46, %v534_v48 }
 0x1b0   :  { %v643_v49 = vpop.f32.mrf.mxu1  ;;  %1022 = vmatmul.mubr.msk.f32.vlgmr.msra.gmra.mxu0 %vm676_vm4, %v663_v45 }
 0x1b1   :  { %v664_v50 = vmul.f32 %v643_v49, %v529_v47 }
 0x1b2   :  { %v1004_v52 = vpop.f32.mrf.mxu1 }
 0x1b3   :  { %1024 = vmatprep.mubr.msk.f32.mxu0 %vm676_vm4, %v664_v50  ;;  %v667_v57 = vmul.f32 %v1004_v52, %v544_v54 }
 0x1b4   :  { %v653_v55 = vpop.f32.mrf.mxu1  ;;  %1025 = vmatmul.mubr.msk.f32.gmra.mxu0 %vm676_vm4, %v665_v51 }
 0x1b5   :  { %v666_v56 = vmul.f32 %v653_v55, %v539_v53 }
 0x1b7   :  { %1027 = vmatprep.mubr.msk.f32.mxu0 %vm676_vm4, %v666_v56 }
 0x1b8   :  { %1028 = vmatmul.mubr.msk.f32.gmra.mxu0 %vm676_vm4, %v667_v57 }
 0x270   :  { %v1023_v60 = vpop.f32.mrf.mxu0 }
 0x271   :  { %v767_v62 = vadd.f32 %v1023_v60, %v418_v59 }
 0x272   :  { %v761_v63 = vpop.f32.mrf.mxu0 }
 0x273   :  { %791 = vst.msk [vmem:[%s1314_s12 + $0x8] sm:$0xff] %vm548_vm3, %v767_v62  ;;  %v762_v1 = vadd.f32 %v761_v63, %v413_v61 }
 0x274   :  { %v1026_v2 = vpop.f32.mrf.mxu0 }
 0x275   :  { %790 = vst.msk [vmem:[%s1314_s12] sm:$0xff] %vm548_vm3, %v762_v1  ;;  %v777_v4 = vadd.f32 %v1026_v2, %v428_v0 }
 0x276   :  { %v771_v5 = vpop.f32.mrf.mxu0 }
 0x277   :  { %793 = vst.msk [vmem:[%s1314_s12 + $0x18] sm:$0xff] %vm548_vm3, %v777_v4  ;;  %v772_v7 = vadd.f32 %v771_v5, %v423_v3 }
 0x278   :  { %v1029_v8 = vpop.f32.mrf.mxu0 }
 0x279   :  { %792 = vst.msk [vmem:[%s1314_s12 + $0x10] sm:$0xff] %vm548_vm3, %v772_v7  ;;  %v787_v10 = vadd.f32 %v1029_v8, %v438_v6 }
 0x27a   :  { %v781_v11 = vpop.f32.mrf.mxu0 }
 0x27b   :  { %795 = vst.msk [vmem:[%s1314_s12 + $0x28] sm:$0xff] %vm548_vm3, %v787_v10  ;;  %v782_v12 = vadd.f32 %v781_v11, %v433_v9 }
 0x27d   :  { %794 = vst.msk [vmem:[%s1314_s12 + $0x20] sm:$0xff] %vm548_vm3, %v782_v12 }

// kernel: forward.9
= control target key start
LH: loop header
LB: loop body
LE: loop exit
PB: predicated region body
PF: predicated region fallthrough
CT: control target
= control target key end

     0   :  { %v45_v0 = vlaneseq  ;;  %v844_v1 = vmov 0.0   ;;  %v845_v10 = vmov 0   ;;  %vm83_vm8 = vcmask 392192   ;;  %s1290_s3 = inlined_call_operand.vmem [shape: f32[48,128], index: 3, kind: input, shape index: {}]   ;;  %s1291_s0 = inlined_call_operand.vmem [shape: s32[1,48], index: 0, kind: input, shape index: {}]   ;;  %s1292_s1 = inlined_call_operand.vmem [shape: s32[1,48], index: 1, kind: input, shape index: {}]   ;;  %s1293_s2 = inlined_call_operand.vmem [shape: f32[1,48], index: 2, kind: input, shape index: {}]   ;;  %s1294_s4 = inlined_call_operand.vmem [shape: f32[384,128], index: 4, kind: input, shape index: {}]   ;;  %s1295_s5 = inlined_call_operand.vmem [shape: f32[1,128], index: 5, kind: input, shape index: {}]   ;;  %s1296_s6 = inlined_call_operand.vmem [shape: f32[24,128], index: 6, kind: output, shape index: {}]  }
   0x1   :  { %737 = vmatprep.subr.mxu0 %v844_v1  ;;  %758 = vmatprep.subr.mxu1 %v844_v1  ;;  %v887_v2 = vld [vmem:[%s1290_s3 + $0x28] sm:$0xff]  ;;  %v892_v3 = vld [vmem:[%s1290_s3 + $0x20] sm:$0xff]  ;;  %v903_v5 = vld [vmem:[%s1290_s3 + $0x18] sm:$0xff]  ;;  %vm846_vm10 = vmmov 0  }
   0x2   :  { %738 = vmatpush3.msra.mxu0 %v887_v2  ;;  %759 = vmatpush3.msra.mxu1 %v887_v2  ;;  %v896_v4 = vshrl.u32 %v45_v0, 7  ;;  %v908_v6 = vld [vmem:[%s1291_s0] ss:$0 sm:$0xff]  ;;  %v921_v9 = vld [vmem:[%s1290_s3 + $0x10] sm:$0xff]  ;;  %v935_v15 = vld [vmem:[%s1290_s3 + $0x8] sm:$0xff] }
   0x3   :  { %739 = vmatprep.subr.mxu0 %v844_v1  ;;  %760 = vmatprep.subr.mxu1 %v844_v1  ;;  %v37_v7 = vld [vmem:[%s1292_s1] sm:$0x1]  ;;  %v444_v29 = vld [vmem:[%s1294_s4 + $0xf8] sm:$0xff]  ;;  %v443_v39 = vld [vmem:[%s1294_s4 + $0xf0] sm:$0xff] }
   0x4   :  { %740 = vmatpush3.msra.mxu0 %v892_v3  ;;  %761 = vmatpush3.msra.mxu1 %v892_v3  ;;  %vm61_vm0 = vcmp.eq.s32.totalorder %v37_v7, 0  ;;  %v65_v8 = vsub.s32 0, %v896_v4  ;;  %vm179_vm1 = vcmp.eq.s32.totalorder %v37_v7, 1  ;;  %v924_v12 = vadd.s32 8, %v896_v4  ;;  %v942_v17 = vld [vmem:[%s1293_s2] ss:$0 sm:$0xff] }
   0x5   :  { %741 = vmatprep.subr.mxu0 %v844_v1  ;;  %762 = vmatprep.subr.mxu1 %v844_v1  ;;  %v62_v11 = vsel %vm61_vm0, 1, %v845_v10  ;;  %vm58_vm2 = vcmp.eq.s32.totalorder %v896_v4, %v908_v6  ;;  %v180_v14 = vsel %vm179_vm1, 1, %v845_v10  ;;  %vm290_vm4 = vcmp.eq.s32.totalorder %v37_v7, 2  ;;  %v39_v19 = vld [vmem:[%s1290_s3] sm:$0xff]  ;;  %v428_v38 = vld [vmem:[%s1294_s4 + $0x78] sm:$0xff]  ;;  %v427_v41 = vld [vmem:[%s1294_s4 + $0x70] sm:$0xff] }
   0x6   :  { %742 = vmatpush3.msra.mxu0 %v903_v5  ;;  %763 = vmatpush3.msra.mxu1 %v903_v5  ;;  %v66_v13 = vrot.slane %v62_v11, %v65_v8  ;;  %v184_v16 = vrot.slane %v180_v14, %v65_v8  ;;  %vm59_vm7 = vcmp.eq.s32.totalorder %v924_v12, %v908_v6  ;;  %v969_v22 = vadd.s32 16, %v896_v4  ;;  %v442_v43 = vld [vmem:[%s1294_s4 + $0xe8] sm:$0xff]  ;;  %v441_v45 = vld [vmem:[%s1294_s4 + $0xe0] sm:$0xff]  ;;  %v460_v46 = vld [vmem:[%s1294_s4 + $0x178] sm:$0xff] }
   0x7   :  { %743 = vmatprep.subr.mxu0 %v844_v1  ;;  %764 = vmatprep.subr.mxu1 %v844_v1  ;;  %v291_v24 = vsel %vm290_vm4, 1, %v845_v10  ;;  %v426_v44 = vld [vmem:[%s1294_s4 + $0x68] sm:$0xff]  ;;  %v425_v48 = vld [vmem:[%s1294_s4 + $0x60] sm:$0xff]  ;;  %v440_v50 = vld [vmem:[%s1294_s4 + $0xd8] sm:$0xff] }
   0x8   :  { %744 = vmatpush3.msra.mxu0 %v921_v9  ;;  %765 = vmatpush3.msra.mxu1 %v921_v9  ;;  %vm944_vm3 = vcmp.eq.s32.totalorder %v66_v13, 1  ;;  %vm962_vm6 = vcmp.eq.s32.totalorder %v184_v16, 1  ;;  %vm60_vm13 = vcmp.eq.s32.totalorder %v969_v22, %v908_v6  ;;  %v295_v28 = vrot.slane %v291_v24, %v65_v8  ;;  %v424_v51 = vld [vmem:[%s1294_s4 + $0x58] sm:$0xff]  ;;  %v439_v52 = vld [vmem:[%s1294_s4 + $0xd0] sm:$0xff]  ;;  %v438_v56 = vld [vmem:[%s1294_s4 + $0xc8] sm:$0xff] }
   0x9   :  { %745 = vmatprep.subr.mxu0 %v844_v1  ;;  %766 = vmatprep.subr.mxu1 %v844_v1  ;;  %vm958_vm5 = vmand %vm58_vm2, %vm944_vm3  ;;  %v459_v53 = vld [vmem:[%s1294_s4 + $0x170] sm:$0xff]  ;;  %v422_v57 = vld [vmem:[%s1294_s4 + $0x48] sm:$0xff] }
   0xa   :  { %746 = vmatpush3.msra.mxu0 %v935_v15  ;;  %767 = vmatpush3.msra.mxu1 %v935_v15  ;;  %v77_v23 = vsel %vm958_vm5, %v942_v17, 0.0  ;;  %vm186_vm9 = vmand %vm58_vm2, %vm962_vm6  ;;  %vm1044_vm0 = vcmp.eq.s32.totalorder %v295_v28, 1  ;;  %v423_v55 = vld [vmem:[%s1294_s4 + $0x50] sm:$0xff]  ;;  %v458_v58 = vld [vmem:[%s1294_s4 + $0x168] sm:$0xff] }
   0xb   :  { %747 = vmatprep.subr.mxu0 %v844_v1  ;;  %768 = vmatprep.subr.mxu1 %v844_v1  ;;  %v189_v25 = vsel %vm186_vm9, %v942_v17, 0.0  ;;  %vm991_vm11 = vmand %vm59_vm7, %vm944_vm3  ;;  %v437_v59 = vld [vmem:[%s1294_s4 + $0xc0] sm:$0xff]  ;;  %v436_v62 = vld [vmem:[%s1294_s4 + $0xb8] sm:$0xff] }
   0xc   :  { %748 = vmatpush3.msra.mxu0 %v39_v19  ;;  %749 = vmatprep.mubr.msk.f32.mxu0 %vm846_vm10, %v844_v1  ;;  %vm1002_vm12 = vmand %vm59_vm7, %vm962_vm6  ;;  %v78_v31 = vsel %vm991_vm11, %v942_v17, 0.0  ;;  %v421_v60 = vld [vmem:[%s1294_s4 + $0x40] sm:$0xff]  ;;  %v420_v63 = vld [vmem:[%s1294_s4 + $0x38] sm:$0xff] }
   0xd   :  { %769 = vmatpush3.msra.mxu1 %v39_v19  ;;  %770 = vmatprep.mubr.msk.f32.mxu1 %vm846_vm10, %v844_v1  ;;  %v190_v30 = vsel %vm1002_vm12, %v942_v17, 0.0  ;;  %vm1030_vm14 = vmand %vm60_vm13, %vm962_vm6  ;;  %v457_v61 = vld [vmem:[%s1294_s4 + $0x160] sm:$0xff]  ;;  %v456_v0 = vld [vmem:[%s1294_s4 + $0x158] sm:$0xff] }
   0xe   :  { %750 = vmatmul.mubr.msk.f32.vlgmr.msra.gmra.mxu0 %vm83_vm8, %v77_v23  ;;  %771 = vmatmul.mubr.msk.f32.vlgmr.msra.gmra.mxu1 %vm83_vm8, %v189_v25  ;;  %vm1040_vm15 = vmand %vm60_vm13, %vm944_vm3  ;;  %v191_v35 = vsel %vm1030_vm14, %v942_v17, 0.0  ;;  %v455_v4 = vld [vmem:[%s1294_s4 + $0x150] sm:$0xff]  ;;  %v418_v6 = vld [vmem:[%s1294_s4 + $0x28] sm:$0xff] }
   0xf   :  { %779 = vmatprep.subr.mxu0 %v844_v1  ;;  %752 = vmatprep.mubr.msk.f32.mxu0 %vm846_vm10, %v844_v1  ;;  %v79_v36 = vsel %vm1040_vm15, %v942_v17, 0.0  ;;  %vm1066_vm1 = vmand %vm58_vm2, %vm1044_vm0  ;;  %v454_v7 = vld [vmem:[%s1294_s4 + $0x148] sm:$0xff]  ;;  %v433_v8 = vld [vmem:[%s1294_s4 + $0xa0] sm:$0xff] }
  0x10   :  { %780 = vmatpush3.msra.mxu0 %v887_v2  ;;  %773 = vmatprep.mubr.msk.f32.mxu1 %vm846_vm10, %v844_v1  ;;  %v300_v40 = vsel %vm1066_vm1, %v942_v17, 0.0  ;;  %vm1098_vm2 = vmand %vm59_vm7, %vm1044_vm0  ;;  %v435_v2 = vld [vmem:[%s1294_s4 + $0xb0] sm:$0xff]  ;;  %v453_v10 = vld [vmem:[%s1294_s4 + $0x140] sm:$0xff] }
  0x11   :  { %781 = vmatprep.subr.mxu0 %v844_v1  ;;  %677 = vmatprep.subr.mxu1 %v444_v29  ;;  %v301_v47 = vsel %vm1098_vm2, %v942_v17, 0.0  ;;  %vm1128_vm3 = vmand %vm60_vm13, %vm1044_vm0  ;;  %v432_v11 = vld [vmem:[%s1294_s4 + $0x98] sm:$0xff]  ;;  %v431_v14 = vld [vmem:[%s1294_s4 + $0x90] sm:$0xff] }
  0x12   :  { %782 = vmatpush3.msra.mxu0 %v892_v3  ;;  %774 = vmatmul.mubr.msk.f32.gmra.mxu1 %vm83_vm8, %v190_v30  ;;  %v302_v54 = vsel %vm1128_vm3, %v942_v17, 0.0  ;;  %v419_v3 = vld [vmem:[%s1294_s4 + $0x30] sm:$0xff]  ;;  %v416_v12 = vld [vmem:[%s1294_s4 + $0x18] sm:$0xff]  ;;  %v430_v16 = vld [vmem:[%s1294_s4 + $0x88] sm:$0xff] }
  0x13   :  { %753 = vmatmul.mubr.msk.f32.gmra.mxu0 %vm83_vm8, %v78_v31  ;;  %783 = vmatprep.subr.mxu0 %v844_v1  ;;  %v452_v13 = vld [vmem:[%s1294_s4 + $0x138] sm:$0xff]  ;;  %v414_v17 = vld [vmem:[%s1294_s4 + $0x8] sm:$0xff]  ;;  %v429_v18 = vld [vmem:[%s1294_s4 + $0x80] sm:$0xff] }
  0x14   :  { %784 = vmatpush3.msra.mxu0 %v903_v5  ;;  %755 = vmatprep.mubr.msk.f32.mxu0 %vm846_vm10, %v844_v1  ;;  %v434_v5 = vld [vmem:[%s1294_s4 + $0xa8] sm:$0xff]  ;;  %v413_v20 = vld [vmem:[%s1294_s4] sm:$0xff]  ;;  %v448_v23 = vld [vmem:[%s1294_s4 + $0x118] sm:$0xff] }
  0x15   :  { %785 = vmatprep.subr.mxu0 %v844_v1  ;;  %776 = vmatprep.mubr.msk.f32.mxu1 %vm846_vm10, %v844_v1  ;;  %v450_v21 = vld [vmem:[%s1294_s4 + $0x128] sm:$0xff]  ;;  %v449_v22 = vld [vmem:[%s1294_s4 + $0x120] sm:$0xff]  ;;  %v447_v24 = vld [vmem:[%s1294_s4 + $0x110] sm:$0xff] }
  0x16   :  { %786 = vmatpush3.msra.mxu0 %v921_v9  ;;  %777 = vmatmul.mubr.msk.f32.gmra.mxu1 %vm83_vm8, %v191_v35  ;;  %v417_v9 = vld [vmem:[%s1294_s4 + $0x20] sm:$0xff]  ;;  %v446_v25 = vld [vmem:[%s1294_s4 + $0x108] sm:$0xff] }
  0x17   :  { %756 = vmatmul.mubr.msk.f32.gmra.mxu0 %vm83_vm8, %v79_v36  ;;  %787 = vmatprep.subr.mxu0 %v844_v1  ;;  %v445_v26 = vld [vmem:[%s1294_s4 + $0x100] sm:$0xff] }
  0x18   :  { %788 = vmatpush3.msra.mxu0 %v935_v15  ;;  %791 = vmatprep.mubr.msk.f32.mxu0 %vm846_vm10, %v844_v1  ;;  %v415_v15 = vld [vmem:[%s1294_s4 + $0x10] sm:$0xff] }
  0x19   :  { %789 = vmatprep.subr.mxu0 %v844_v1  ;;  %678 = vmatpush3.msra.mxu1 %v428_v38 }
  0x1a   :  { %790 = vmatpush3.msra.mxu0 %v39_v19  ;;  %679 = vmatprep.subr.mxu1 %v443_v39  ;;  %v451_v19 = vld [vmem:[%s1294_s4 + $0x130] sm:$0xff] }
  0x1b   :  { %792 = vmatmul.mubr.msk.f32.vlgmr.msra.gmra.mxu0 %vm83_vm8, %v300_v40  ;;  %680 = vmatpush3.msra.mxu1 %v427_v41 }
  0x1c   :  { %794 = vmatprep.mubr.msk.f32.mxu0 %vm846_vm10, %v844_v1  ;;  %681 = vmatprep.subr.mxu1 %v442_v43 }
  0x1d   :  { %682 = vmatpush3.msra.mxu1 %v426_v44  ;;  %800 = vmatprep.subr.mxu0 %v844_v1 }
  0x1e   :  { %683 = vmatprep.subr.mxu1 %v441_v45  ;;  %801 = vmatpush3.msra.mxu0 %v460_v46 }
  0x1f   :  { %795 = vmatmul.mubr.msk.f32.gmra.mxu0 %vm83_vm8, %v301_v47  ;;  %684 = vmatpush3.msra.mxu1 %v425_v48 }
  0x20   :  { %797 = vmatprep.mubr.msk.f32.mxu0 %vm846_vm10, %v844_v1  ;;  %685 = vmatprep.subr.mxu1 %v440_v50 }
  0x21   :  { %686 = vmatpush3.msra.mxu1 %v424_v51  ;;  %802 = vmatprep.subr.mxu0 %v844_v1  ;;  %v649_v51 = vld [vmem:[%s1295_s5] ss:$0 sm:$0xff] }
  0x22   :  { %687 = vmatprep.subr.mxu1 %v439_v52  ;;  %803 = vmatpush3.msra.mxu0 %v459_v53 }
  0x23   :  { %798 = vmatmul.mubr.msk.f32.gmra.mxu0 %vm83_vm8, %v302_v54  ;;  %688 = vmatpush3.msra.mxu1 %v423_v55 }
  0x24   :  { %689 = vmatprep.subr.mxu1 %v438_v56  ;;  %804 = vmatprep.subr.mxu0 %v844_v1 }
  0x25   :  { %690 = vmatpush3.msra.mxu1 %v422_v57  ;;  %805 = vmatpush3.msra.mxu0 %v458_v58 }
  0x26   :  { %691 = vmatprep.subr.mxu1 %v437_v59  ;;  %806 = vmatprep.subr.mxu0 %v844_v1 }
  0x27   :  { %692 = vmatpush3.msra.mxu1 %v421_v60  ;;  %807 = vmatpush3.msra.mxu0 %v457_v61 }
  0x28   :  { %693 = vmatprep.subr.mxu1 %v436_v62  ;;  %808 = vmatprep.subr.mxu0 %v844_v1 }
  0x29   :  { %694 = vmatpush3.msra.mxu1 %v420_v63  ;;  %809 = vmatpush3.msra.mxu0 %v456_v0 }
  0x2a   :  { %695 = vmatprep.subr.mxu1 %v435_v2  ;;  %810 = vmatprep.subr.mxu0 %v844_v1 }
  0x2b   :  { %696 = vmatpush3.msra.mxu1 %v419_v3  ;;  %811 = vmatpush3.msra.mxu0 %v455_v4 }
  0x2c   :  { %697 = vmatprep.subr.mxu1 %v434_v5  ;;  %812 = vmatprep.subr.mxu0 %v844_v1 }
  0x2d   :  { %698 = vmatpush3.msra.mxu1 %v418_v6  ;;  %813 = vmatpush3.msra.mxu0 %v454_v7 }
  0x2e   :  { %699 = vmatprep.subr.mxu1 %v433_v8  ;;  %814 = vmatprep.subr.mxu0 %v844_v1 }
  0x2f   :  { %700 = vmatpush3.msra.mxu1 %v417_v9  ;;  %815 = vmatpush3.msra.mxu0 %v453_v10 }
  0x30   :  { %701 = vmatprep.subr.mxu1 %v432_v11  ;;  %816 = vmatprep.subr.mxu0 %v844_v1 }
  0x31   :  { %702 = vmatpush3.msra.mxu1 %v416_v12  ;;  %817 = vmatpush3.msra.mxu0 %v452_v13 }
  0x32   :  { %703 = vmatprep.subr.mxu1 %v431_v14  ;;  %818 = vmatprep.subr.mxu0 %v844_v1 }
  0x33   :  { %704 = vmatpush3.msra.mxu1 %v415_v15  ;;  %832 = vmatprep.mubr.msk.f32.mxu0 %vm846_vm10, %v844_v1 }
  0x34   :  { %705 = vmatprep.subr.mxu1 %v430_v16  ;;  %819 = vmatpush3.msra.mxu0 %v451_v19 }
  0x35   :  { %706 = vmatpush3.msra.mxu1 %v414_v17  ;;  %820 = vmatprep.subr.mxu0 %v844_v1 }
  0x36   :  { %707 = vmatprep.subr.mxu1 %v429_v18  ;;  %821 = vmatpush3.msra.mxu0 %v450_v21 }
  0x37   :  { %708 = vmatpush3.msra.mxu1 %v413_v20  ;;  %822 = vmatprep.subr.mxu0 %v844_v1 }
  0x38   :  { %823 = vmatpush3.msra.mxu0 %v449_v22 }
  0x39   :  { %824 = vmatprep.subr.mxu0 %v844_v1 }
  0x3a   :  { %825 = vmatpush3.msra.mxu0 %v448_v23 }
  0x3b   :  { %826 = vmatprep.subr.mxu0 %v844_v1 }
  0x3c   :  { %827 = vmatpush3.msra.mxu0 %v447_v24 }
  0x3d   :  { %828 = vmatprep.subr.mxu0 %v844_v1 }
  0x3e   :  { %829 = vmatpush3.msra.mxu0 %v446_v25 }
  0x3f   :  { %830 = vmatprep.subr.mxu0 %v844_v1 }
  0x40   :  { %831 = vmatpush3.msra.mxu0 %v445_v26 }
  0xce   :  { %v159_v27 = vpop.f32.mrf.mxu0  ;;  %v270_v28 = vpop.f32.mrf.mxu1 }
  0xcf   :  { %532 = vmatprep.mubr.f32.mxu1 %v270_v28 }
  0xd0   :  { %v751_v29 = vpop.f32.mrf.mxu0  ;;  %v772_v30 = vpop.f32.mrf.mxu1  ;;  %533 = vmatmul.mubr.f32.vlgmr.msra.gmra.mxu1 %v159_v27 }
  0xd2   :  { %v275_v31 = vpop.f32.mrf.mxu1 }
  0xd3   :  { %v164_v32 = vpop.f32.mrf.mxu0  ;;  %537 = vmatprep.mubr.f32.mxu1 %v275_v31 }
  0xd4   :  { %v775_v33 = vpop.f32.mrf.mxu1  ;;  %538 = vmatmul.mubr.f32.gmra.mxu1 %v164_v32 }
  0xd5   :  { %v754_v34 = vpop.f32.mrf.mxu0 }
  0xd6   :  { %v280_v35 = vpop.f32.mrf.mxu1 }
  0xd7   :  { %v169_v36 = vpop.f32.mrf.mxu0  ;;  %542 = vmatprep.mubr.f32.mxu1 %v280_v35 }
  0xd8   :  { %543 = vmatmul.mubr.f32.gmra.mxu1 %v169_v36  ;;  %v778_v37 = vpop.f32.mrf.mxu1 }
  0xd9   :  { %v757_v38 = vpop.f32.mrf.mxu0 }
  0xdb   :  { %v381_v39 = vpop.f32.mrf.mxu0 }
  0xdc   :  { %833 = vmatmul.mubr.f32.vlgmr.msra.gmra.mxu0 %v381_v39 }
  0xdd   :  { %v793_v40 = vpop.f32.mrf.mxu0  ;;  %835 = vmatprep.mubr.msk.f32.mxu0 %vm846_vm10, %v844_v1 }
  0xdf   :  { %v386_v41 = vpop.f32.mrf.mxu0 }
  0xe0   :  { %836 = vmatmul.mubr.f32.gmra.mxu0 %v386_v41 }
  0xe1   :  { %v796_v42 = vpop.f32.mrf.mxu0  ;;  %838 = vmatprep.mubr.msk.f32.mxu0 %vm846_vm10, %v844_v1 }
  0xe3   :  { %v391_v43 = vpop.f32.mrf.mxu0 }
  0xe4   :  { %839 = vmatmul.mubr.f32.gmra.mxu0 %v391_v43 }
  0xe5   :  { %v799_v44 = vpop.f32.mrf.mxu0 }
 0x190   :  { %v709_v45 = vpop.f32.mrf.mxu1 }
 0x192   :  { %v710_v46 = vpop.f32.mrf.mxu1 }
 0x193   :  { %v711_v49 = vadd.f32 %v710_v46, %v709_v45 }
 0x194   :  { %v712_v47 = vpop.f32.mrf.mxu1 }
 0x195   :  { %v535_v53 = vadd.f32 %v711_v49, %v649_v51 }
 0x196   :  { %v713_v48 = vpop.f32.mrf.mxu1 }
 0x197   :  { %v714_v52 = vadd.f32 %v713_v48, %v712_v47 }
 0x198   :  { %v715_v50 = vpop.f32.mrf.mxu1 }
 0x199   :  { %v540_v59 = vadd.f32 %v714_v52, %v649_v51 }
 0x19a   :  { %v716_v54 = vpop.f32.mrf.mxu1 }
 0x19b   :  { %v717_v1 = vadd.f32 %v716_v54, %v715_v50 }
 0x19c   :  { %v614_v55 = vpop.f32.mrf.mxu0 }
 0x19d   :  { %v615_v56 = vadd.f32 %v614_v55, %v535_v53  ;;  %v545_v0 = vadd.f32 %v717_v1, %v649_v51 }
 0x19e   :  { %v834_v57 = vpop.f32.mrf.mxu0 }
 0x19f   :  { %v628_v58 = vmax.f32 %v615_v56, 0.0 }
 0x1a0   :  { %v619_v60 = vpop.f32.mrf.mxu0 }
 0x1a1   :  { %631 = vst [vmem:[%s1296_s6] sm:$0xff] %v628_v58  ;;  %v620_v61 = vadd.f32 %v619_v60, %v540_v59 }
 0x1a2   :  { %v837_v62 = vpop.f32.mrf.mxu0 }
 0x1a3   :  { %v629_v63 = vmax.f32 %v620_v61, 0.0 }
 0x1a4   :  { %v624_v2 = vpop.f32.mrf.mxu0 }
 0x1a5   :  { %632 = vst [vmem:[%s1296_s6 + $0x8] sm:$0xff] %v629_v63  ;;  %v625_v3 = vadd.f32 %v624_v2, %v545_v0 }
 0x1a6   :  { %v840_v4 = vpop.f32.mrf.mxu0 }
 0x1a7   :  { %v630_v5 = vmax.f32 %v625_v3, 0.0 }
 0x1a9   :  { %633 = vst [vmem:[%s1296_s6 + $0x10] sm:$0xff] %v630_v5 }

// kernel: forward.11
= control target key start
LH: loop header
LB: loop body
LE: loop exit
PB: predicated region body
PF: predicated region fallthrough
CT: control target
= control target key end

     0   :  { %v42_v0 = vlaneseq  ;;  %v348_v1 = vmov 0.0   ;;  %vm349_vm0 = vmmov 0   ;;  %vm30_vm1 = vcmask 64512   ;;  %s478_s2 = inlined_call_operand.vmem [shape: f32[48,8], index: 2, kind: input, shape index: {}]   ;;  %s479_s0 = inlined_call_operand.vmem [shape: s32[1,48], index: 0, kind: input, shape index: {}]   ;;  %s480_s1 = inlined_call_operand.vmem [shape: f32[1,48], index: 1, kind: input, shape index: {}]   ;;  %s481_s3 = inlined_call_operand.vmem [shape: f32[8,128], index: 3, kind: input, shape index: {}]   ;;  %s482_s4 = inlined_call_operand.vmem [shape: f32[1,128], index: 4, kind: input, shape index: {}]   ;;  %s483_s5 = inlined_call_operand.vmem [shape: f32[24,128], index: 5, kind: input, shape index: {}]   ;;  %s484_s6 = inlined_call_operand.vmem [shape: f32[24,128], index: 6, kind: input, shape index: {}]   ;;  %s485_s7 = inlined_call_operand.vmem [shape: f32[24,128], index: 7, kind: output, shape index: {}]  }
   0x1   :  { %314 = vmatprep.subr.mxu0 %v348_v1  ;;  %v41_v2 = vld [vmem:[%s478_s2 + $0x28] sm:$0xff]  ;;  %v40_v3 = vld [vmem:[%s478_s2 + $0x20] sm:$0xff]  ;;  %326 = vmatprep.mubr.msk.f32.mxu0 %vm349_vm0, %v348_v1  ;;  %31 = vst.msk [vmem:[#allocation2] sm:$0xff] %vm30_vm1, %v348_v1  ;;  %32 = vst.msk [vmem:[#allocation2 + $0x8] sm:$0xff] %vm30_vm1, %v348_v1  ;;  %vm70_vm3 = vcmask 392192  }
   0x2   :  { %315 = vmatpush3.msra.mxu0 %v41_v2  ;;  %33 = vst.msk [vmem:[#allocation2 + $0x10] sm:$0xff] %vm30_vm1, %v348_v1  ;;  %335 = vmatprep.subr.mxu1 %v348_v1  ;;  %v39_v4 = vld [vmem:[%s478_s2 + $0x18] sm:$0xff]  ;;  %v43_v5 = vshrl.u32 %v42_v0, 7  ;;  %v292_v6 = vld [vmem:[%s479_s0] ss:$0 sm:$0xff]  ;;  %v38_v7 = vld [vmem:[%s478_s2 + $0x10] sm:$0xff] }
   0x3   :  { %316 = vmatprep.subr.mxu0 %v348_v1  ;;  %337 = vmatprep.mubr.msk.f32.mxu1 %vm349_vm0, %v348_v1  ;;  %v37_v8 = vld [vmem:[%s478_s2 + $0x8] sm:$0xff]  ;;  %v293_v9 = vld [vmem:[%s480_s1] ss:$0 sm:$0xff]  ;;  %v275_v50 = vld [vmem:[%s483_s5 + $0x10] sm:$0xff] }
   0x4   :  { %317 = vmatpush3.msra.mxu0 %v40_v3  ;;  %vm55_vm2 = vcmp.eq.s32.totalorder %v43_v5, %v292_v6  ;;  %v44_v10 = vadd.s32 8, %v43_v5  ;;  %v36_v11 = vld [vmem:[%s478_s2] sm:$0xff]  ;;  %v45_v13 = vadd.s32 16, %v43_v5  ;;  %v274_v43 = vld [vmem:[%s483_s5 + $0x8] sm:$0xff]  ;;  %v281_v53 = vld [vmem:[%s484_s6 + $0x10] sm:$0xff] }
   0x5   :  { %318 = vmatprep.subr.mxu0 %v348_v1  ;;  %v64_v12 = vsel %vm55_vm2, %v293_v9, 0.0  ;;  %v176_v16 = vld [vmem:[%s481_s3] sm:$0xff]  ;;  %v280_v46 = vld [vmem:[%s484_s6 + $0x8] sm:$0xff] }
   0x6   :  { %319 = vmatpush3.msra.mxu0 %v39_v4  ;;  %vm56_vm4 = vcmp.eq.s32.totalorder %v44_v10, %v292_v6  ;;  %vm57_vm5 = vcmp.eq.s32.totalorder %v45_v13, %v292_v6  ;;  %336 = vmatpush3.msra.mxu1 %v176_v16  ;;  %v297_v35 = vld [vmem:[%s482_s4] ss:$0 sm:$0xff] }
   0x7   :  { %320 = vmatprep.subr.mxu0 %v348_v1  ;;  %v65_v14 = vsel %vm56_vm4, %v293_v9, 0.0  ;;  %v66_v15 = vsel %vm57_vm5, %v293_v9, 0.0  ;;  %v273_v37 = vld [vmem:[%s483_s5] sm:$0xff] }
   0x8   :  { %321 = vmatpush3.msra.mxu0 %v38_v7  ;;  %v67_v17 = vld [vmem:[#allocation2] sm:$0xff]  ;;  %v68_v21 = vld [vmem:[#allocation2 + $0x8] sm:$0xff] }
   0x9   :  { %322 = vmatprep.subr.mxu0 %v348_v1  ;;  %v69_v25 = vld [vmem:[#allocation2 + $0x10] sm:$0xff]  ;;  %v279_v39 = vld [vmem:[%s484_s6] sm:$0xff] }
   0xa   :  { %323 = vmatpush3.msra.mxu0 %v37_v8 }
   0xb   :  { %324 = vmatprep.subr.mxu0 %v348_v1 }
   0xc   :  { %325 = vmatpush3.msra.mxu0 %v36_v11 }
   0xd   :  { %327 = vmatmul.mubr.msk.f32.vlgmr.msra.gmra.mxu0 %vm70_vm3, %v64_v12 }
   0xe   :  { %329 = vmatprep.mubr.msk.f32.mxu0 %vm349_vm0, %v348_v1 }
  0x11   :  { %330 = vmatmul.mubr.msk.f32.gmra.mxu0 %vm70_vm3, %v65_v14 }
  0x12   :  { %332 = vmatprep.mubr.msk.f32.mxu0 %vm349_vm0, %v348_v1 }
  0x15   :  { %333 = vmatmul.mubr.msk.f32.gmra.mxu0 %vm70_vm3, %v66_v15 }
  0xcd   :  { %v146_v18 = vpop.f32.mrf.mxu0 }
  0xce   :  { %v160_v19 = vadd.f32 %v146_v18, %v67_v17 }
  0xcf   :  { %v328_v20 = vpop.f32.mrf.mxu0 }
  0xd0   :  { %164 = vst.msk [vmem:[#allocation2] sm:$0xff] %vm30_vm1, %v160_v19 }
  0xd1   :  { %v151_v22 = vpop.f32.mrf.mxu0 }
  0xd2   :  { %v161_v23 = vadd.f32 %v151_v22, %v68_v21 }
  0xd3   :  { %v331_v24 = vpop.f32.mrf.mxu0 }
  0xd4   :  { %165 = vst.msk [vmem:[#allocation2 + $0x8] sm:$0xff] %vm30_vm1, %v161_v23 }
  0xd5   :  { %v156_v26 = vpop.f32.mrf.mxu0 }
  0xd6   :  { %v162_v27 = vadd.f32 %v156_v26, %v69_v25 }
  0xd7   :  { %v334_v28 = vpop.f32.mrf.mxu0  ;;  %v170_v29 = vld [vmem:[#allocation2] sm:$0xff] }
  0xd8   :  { %166 = vst.msk [vmem:[#allocation2 + $0x10] sm:$0xff] %vm30_vm1, %v162_v27  ;;  %v173_v30 = vmax.f32 %v170_v29, 0.0 }
  0xda   :  { %338 = vmatmul.mubr.msk.f32.vlgmr.msra.gmra.mxu1 %vm30_vm1, %v173_v30 }
  0xdb   :  { %340 = vmatprep.mubr.msk.f32.mxu1 %vm349_vm0, %v348_v1  ;;  %v171_v31 = vld [vmem:[#allocation2 + $0x8] sm:$0xff] }
  0xdc   :  { %v174_v32 = vmax.f32 %v171_v31, 0.0 }
  0xde   :  { %341 = vmatmul.mubr.msk.f32.gmra.mxu1 %vm30_vm1, %v174_v32 }
  0xdf   :  { %343 = vmatprep.mubr.msk.f32.mxu1 %vm349_vm0, %v348_v1  ;;  %v172_v33 = vld [vmem:[#allocation2 + $0x10] sm:$0xff] }
  0xe0   :  { %v175_v34 = vmax.f32 %v172_v33, 0.0 }
  0xe2   :  { %344 = vmatmul.mubr.msk.f32.gmra.mxu1 %vm30_vm1, %v175_v34 }
 0x19a   :  { %v259_v36 = vpop.f32.mrf.mxu1 }
 0x19b   :  { %v260_v38 = vadd.f32 %v297_v35, %v259_v36 }
 0x19c   :  { %v339_v40 = vpop.f32.mrf.mxu1 }
 0x19d   :  { %v276_v41 = vadd.f32 %v273_v37, %v260_v38 }
 0x19e   :  { %v264_v42 = vpop.f32.mrf.mxu1 }
 0x19f   :  { %v282_v44 = vadd.f32 %v279_v39, %v276_v41  ;;  %v265_v45 = vadd.f32 %v297_v35, %v264_v42 }
 0x1a0   :  { %v342_v47 = vpop.f32.mrf.mxu1 }
 0x1a1   :  { %285 = vst [vmem:[%s485_s7] sm:$0xff] %v282_v44  ;;  %v277_v48 = vadd.f32 %v274_v43, %v265_v45 }
 0x1a2   :  { %v269_v49 = vpop.f32.mrf.mxu1 }
 0x1a3   :  { %v283_v51 = vadd.f32 %v280_v46, %v277_v48  ;;  %v270_v52 = vadd.f32 %v297_v35, %v269_v49 }
 0x1a4   :  { %v345_v54 = vpop.f32.mrf.mxu1 }
 0x1a5   :  { %286 = vst [vmem:[%s485_s7 + $0x8] sm:$0xff] %v283_v51  ;;  %v278_v55 = vadd.f32 %v275_v50, %v270_v52 }
 0x1a7   :  { %v284_v56 = vadd.f32 %v281_v53, %v278_v55 }
 0x1a9   :  { %287 = vst [vmem:[%s485_s7 + $0x10] sm:$0xff] %v284_v56 }

// kernel: forward.15
= control target key start
LH: loop header
LB: loop body
LE: loop exit
PB: predicated region body
PF: predicated region fallthrough
CT: control target
= control target key end

     0   :  { %v24_v0 = vlaneseq  ;;  %v145_v1 = vmov 0.0   ;;  %vm146_vm0 = vmmov 0   ;;  %vm42_vm2 = vcmask 195584   ;;  %s185_s2 = inlined_call_operand.vmem [shape: f32[24,128], index: 2, kind: input, shape index: {}]   ;;  %s186_s0 = inlined_call_operand.vmem [shape: s32[1,24], index: 0, kind: input, shape index: {}]   ;;  %s187_s1 = inlined_call_operand.vmem [shape: f32[1,24], index: 1, kind: input, shape index: {}]   ;;  %s188_s3 = inlined_call_operand.vmem [shape: f32[8,128], index: 3, kind: output, shape index: {}]  }
   0x1   :  { %134 = vmatprep.subr.mxu0 %v145_v1  ;;  %v23_v2 = vld [vmem:[%s185_s2 + $0x10] sm:$0xff]  ;;  %v22_v3 = vld [vmem:[%s185_s2 + $0x8] sm:$0xff]  ;;  %140 = vmatprep.mubr.msk.f32.mxu0 %vm146_vm0, %v145_v1  ;;  %v127_v4 = vld [vmem:[%s186_s0] ss:$0 sm:$0xff] }
   0x2   :  { %135 = vmatpush3.msra.mxu0 %v23_v2  ;;  %v128_v5 = vld [vmem:[%s187_s1] ss:$0 sm:$0xff]  ;;  %v25_v6 = vshrl.u32 %v24_v0, 7 }
   0x3   :  { %136 = vmatprep.subr.mxu0 %v145_v1  ;;  %v21_v7 = vld [vmem:[%s185_s2] sm:$0xff] }
   0x4   :  { %137 = vmatpush3.msra.mxu0 %v22_v3  ;;  %vm33_vm1 = vcmp.eq.s32.totalorder %v25_v6, %v127_v4 }
   0x5   :  { %138 = vmatprep.subr.mxu0 %v145_v1  ;;  %v40_v8 = vsel %vm33_vm1, %v128_v5, 0.0 }
   0x6   :  { %139 = vmatpush3.msra.mxu0 %v21_v7 }
   0x7   :  { %141 = vmatmul.mubr.msk.f32.vlgmr.msra.gmra.mxu0 %vm42_vm2, %v40_v8 }
  0xc7   :  { %v112_v9 = vpop.f32.mrf.mxu0 }
  0xc8   :  { %122 = vst [vmem:[%s188_s3] sm:$0xff] %v112_v9 }
  0xc9   :  { %v142_v10 = vpop.f32.mrf.mxu0 }

</bundles_post_ra>
